<compile_context>
chip_gen: v5e
topology: v5e:2x2
jax: 0.10.0
libtpu: 0.0.40
codegen_flags: <defaults>
</compile_context>

<pallas_src>
import functools

import jax
import jax.numpy as jnp
from jax import lax
from jax.experimental import pallas as pl
from jax.experimental.pallas import tpu as pltpu

MINER_EPS = 0.1     # MultiSimilarityMiner default epsilon
MARGIN = 0.2        # TripletMarginLoss margin
NORM_EPS = 1e-12    # torch.nn.functional.normalize eps


def _triplet_block_kernel(n_valid,          # static: number of real rows (closure)
                          x_ref,            # (N_pad, D) f32 raw embeddings (resident)
                          xblk_ref,         # (TA, D)   f32 anchor-block embeddings
                          lrow_ref,         # (1, N_pad) i32 labels (row layout)
                          lblk_ref,         # (TA, 1)   i32 anchor-block labels
                          psum_ref,         # (1, 8, 128) f32 partial loss sum
                          pcnt_ref):        # (1, 8, 128) f32 partial nonzero count
    b = pl.program_id(0)
    n_pad, _ = x_ref.shape
    ta = xblk_ref.shape[0]

    # --- L2 normalize (x / max(||x||, 1e-12)) ---------------------------------
    x = x_ref[...]
    xn = x / jnp.maximum(jnp.sqrt(jnp.sum(x * x, axis=-1, keepdims=True)), NORM_EPS)
    xb = xblk_ref[...]
    xbn = xb / jnp.maximum(jnp.sqrt(jnp.sum(xb * xb, axis=-1, keepdims=True)), NORM_EPS)

    # --- cosine-similarity rows for this anchor block: ONE well-shaped matmul --
    s = lax.dot_general(xbn, xn, (((1,), (1,)), ((), ())),
                        preferred_element_type=jnp.float32)          # (TA, N_pad)

    # --- lane-dense mining (MultiSimilarityMiner) ------------------------------
    same = lblk_ref[...] == lrow_ref[...]                            # (TA, N_pad)
    col_ids = lax.broadcasted_iota(jnp.int32, (ta, n_pad), 1)
    row_ids = b * ta + lax.broadcasted_iota(jnp.int32, (ta, n_pad), 0)
    valid = (col_ids < n_valid) & (row_ids < n_valid)                # mask padding

    pos_mask = same & (col_ids != row_ids) & valid                   # candidate p
    neg_mask = jnp.logical_not(same) & valid                         # candidate n

    ninf = jnp.float32(-jnp.inf)
    pinf = jnp.float32(jnp.inf)
    neg_max = jnp.max(jnp.where(neg_mask, s, ninf), axis=-1, keepdims=True)  # (TA,1)
    pos_min = jnp.min(jnp.where(pos_mask, s, pinf), axis=-1, keepdims=True)  # (TA,1)

    hard_pos = pos_mask & ((s - MINER_EPS) < neg_max)
    hard_neg = neg_mask & ((s + MINER_EPS) > pos_min)

    # +/-inf sentinels: non-mined entries can never produce a positive violation.
    spm = jnp.where(hard_pos, s, pinf)                               # (TA, N_pad)
    snm = jnp.where(hard_neg, s, ninf)                               # (TA, N_pad)

    # --- triplets: loop over candidate positives p, vectorized over (anchor, n)
    def body(p, carry):
        acc_l, acc_c = carry
        # column spm[:, p] extracted lane-dense via masked max (no lane slicing)
        sp = jnp.max(jnp.where(col_ids == p, spm, ninf),
                     axis=-1, keepdims=True)                         # (TA, 1)
        viol = snm - sp + jnp.float32(MARGIN)                        # (TA, N_pad)
        act = viol > 0.0
        acc_l = acc_l + jnp.where(act, viol, 0.0)
        acc_c = acc_c + act.astype(jnp.float32)
        return acc_l, acc_c

    zero = jnp.zeros((ta, n_pad), jnp.float32)
    if n_pad <= 64:
        acc_l, acc_c = lax.fori_loop(0, n_pad, body, (zero, zero), unroll=True)
    else:
        acc_l, acc_c = lax.fori_loop(0, n_pad, body, (zero, zero))

    # one cross-lane reduce per block (not per step/anchor)
    part_sum = jnp.sum(acc_l)
    part_cnt = jnp.sum(acc_c)
    psum_ref[...] = jnp.broadcast_to(part_sum, psum_ref.shape)
    pcnt_ref[...] = jnp.broadcast_to(part_cnt, pcnt_ref.shape)


def _choose_block(n):
    n8 = ((n + 7) // 8) * 8          # sublane alignment
    ta = min(n8, 128)                # anchors per grid step
    nb = -(-n8 // ta)                # number of anchor blocks
    n_pad = nb * ta
    return ta, nb, n_pad


@jax.jit
def triplet_margin_loss(values, labels):
    values = values.astype(jnp.float32)
    labels = labels.astype(jnp.int32)
    n, d = values.shape
    ta, nb, n_pad = _choose_block(n)

    x = jnp.zeros((n_pad, d), jnp.float32).at[:n, :].set(values)
    lab = jnp.full((n_pad,), -1, jnp.int32).at[:n].set(labels)
    lab_row = lab.reshape(1, n_pad)
    lab_col = lab.reshape(n_pad, 1)

    kernel = functools.partial(_triplet_block_kernel, n)

    grid_spec = pltpu.PrefetchScalarGridSpec(
        num_scalar_prefetch=0,
        grid=(nb,),
        in_specs=[
            pl.BlockSpec((n_pad, d), lambda b: (0, 0)),   # full embeddings (resident)
            pl.BlockSpec((ta, d), lambda b: (b, 0)),      # this block's anchors
            pl.BlockSpec((1, n_pad), lambda b: (0, 0)),   # labels, row layout
            pl.BlockSpec((ta, 1), lambda b: (b, 0)),      # block labels, col layout
        ],
        out_specs=[
            pl.BlockSpec((1, 8, 128), lambda b: (b, 0, 0)),
            pl.BlockSpec((1, 8, 128), lambda b: (b, 0, 0)),
        ],
    )

    psum, pcnt = pl.pallas_call(
        kernel,
        out_shape=(jax.ShapeDtypeStruct((nb, 8, 128), jnp.float32),
                   jax.ShapeDtypeStruct((nb, 8, 128), jnp.float32)),
        grid_spec=grid_spec,
        compiler_params=pltpu.CompilerParams(
            dimension_semantics=("parallel",)),   # blocks independent -> v7x 2-TC
    )(x, x, lab_row, lab_col)

    # tiny final reduce + AvgNonZeroReducer divide in the wrapper
    total = jnp.sum(psum[:, 0, 0])
    count = jnp.sum(pcnt[:, 0, 0])
    return jnp.where(count > 0.0, total / jnp.maximum(count, 1.0),
                     jnp.float32(0.0))


if __name__ == "__main__":
    key = jax.random.PRNGKey(0)
    k_vals, k_lab = jax.random.split(key)
    N, D = 16, 32
    values = jax.random.normal(k_vals, (N, D), dtype=jnp.float32)
    labels = jax.random.randint(k_lab, (N,), 0, 4, dtype=jnp.int32)

    loss = triplet_margin_loss(values, labels)
    jax.block_until_ready(loss)
    print("KERNEL_OK")
</pallas_src>

<mosaic_0001>
module attributes {stable_mosaic.version = 11 : i64} {
  func.func @_triplet_block_kernel(%arg0: i32, %arg1: memref<16x32xf32, #tpu.memory_space<vmem>>, %arg2: memref<16x32xf32, #tpu.memory_space<vmem>>, %arg3: memref<1x16xi32, #tpu.memory_space<vmem>>, %arg4: memref<16x1xi32, #tpu.memory_space<vmem>>, %arg5: memref<1x8x128xf32, #tpu.memory_space<vmem>>, %arg6: memref<1x8x128xf32, #tpu.memory_space<vmem>>) attributes {dimension_semantics = [#tpu.dimension_semantics<parallel>], iteration_bounds = array<i64: 1>, scalar_prefetch = 0 : i64, scratch_operands = 0 : i64, tpu.core_type = #tpu.core_type<tc>, window_params = [{pipeline_mode = #tpu.pipeline_mode<synchronous>, transform_indices = @transform_0, window_bounds = array<i64: 16, 32>}, {transform_indices = @transform_1, window_bounds = array<i64: 16, 32>}, {pipeline_mode = #tpu.pipeline_mode<synchronous>, transform_indices = @transform_2, window_bounds = array<i64: 1, 16>}, {transform_indices = @transform_3, window_bounds = array<i64: 16, 1>}, {transform_indices = @transform_4, window_bounds = array<i64: 1, 8, 128>}, {transform_indices = @transform_5, window_bounds = array<i64: 1, 8, 128>}]} {
    %c0 = arith.constant 0 : index
    %c0_0 = arith.constant 0 : index
    %0 = vector.load %arg1[%c0, %c0_0] : memref<16x32xf32, #tpu.memory_space<vmem>>, vector<16x32xf32>
    %1 = arith.mulf %0, %0 : vector<16x32xf32>
    %cst = arith.constant dense<0.000000e+00> : vector<16xf32>
    %2 = vector.multi_reduction <add>, %1, %cst [1] : vector<16x32xf32> to vector<16xf32>
    %3 = vector.shape_cast %2 : vector<16xf32> to vector<16x1xf32>
    %4 = math.sqrt %3 : vector<16x1xf32>
    %cst_1 = arith.constant 9.99999996E-13 : f32
    %5 = vector.broadcast %cst_1 : f32 to vector<16x1xf32>
    %6 = arith.maximumf %4, %5 : vector<16x1xf32>
    %7 = vector.broadcast %6 : vector<16x1xf32> to vector<16x32xf32>
    %8 = arith.divf %0, %7 : vector<16x32xf32>
    %c0_2 = arith.constant 0 : index
    %c0_3 = arith.constant 0 : index
    %9 = vector.load %arg2[%c0_2, %c0_3] : memref<16x32xf32, #tpu.memory_space<vmem>>, vector<16x32xf32>
    %10 = arith.mulf %9, %9 : vector<16x32xf32>
    %cst_4 = arith.constant dense<0.000000e+00> : vector<16xf32>
    %11 = vector.multi_reduction <add>, %10, %cst_4 [1] : vector<16x32xf32> to vector<16xf32>
    %12 = vector.shape_cast %11 : vector<16xf32> to vector<16x1xf32>
    %13 = math.sqrt %12 : vector<16x1xf32>
    %cst_5 = arith.constant 9.99999996E-13 : f32
    %14 = vector.broadcast %cst_5 : f32 to vector<16x1xf32>
    %15 = arith.maximumf %13, %14 : vector<16x1xf32>
    %16 = vector.broadcast %15 : vector<16x1xf32> to vector<16x32xf32>
    %17 = arith.divf %9, %16 : vector<16x32xf32>
    %cst_6 = arith.constant dense<0.000000e+00> : vector<16x16xf32>
    %18 = tpu.matmul %17, %8, %cst_6 {dimension_numbers = #tpu.dot_dimension_numbers<[1], [1], [0], [0], [0, 0, 1, 0], [], []>} : vector<16x32xf32>, vector<16x32xf32>, vector<16x16xf32> -> vector<16x16xf32>
    %c0_7 = arith.constant 0 : index
    %c0_8 = arith.constant 0 : index
    %19 = vector.load %arg4[%c0_7, %c0_8] : memref<16x1xi32, #tpu.memory_space<vmem>>, vector<16x1xi32>
    %c0_9 = arith.constant 0 : index
    %c0_10 = arith.constant 0 : index
    %20 = vector.load %arg3[%c0_9, %c0_10] : memref<1x16xi32, #tpu.memory_space<vmem>>, vector<1x16xi32>
    %21 = vector.broadcast %19 : vector<16x1xi32> to vector<16x16xi32>
    %22 = vector.broadcast %20 : vector<1x16xi32> to vector<16x16xi32>
    %23 = arith.cmpi eq, %21, %22 : vector<16x16xi32>
    %24 = tpu.iota {dimensions = array<i32: 1>} : vector<16x16xi32>
    %c16_i32 = arith.constant 16 : i32
    %25 = arith.muli %arg0, %c16_i32 : i32
    %26 = tpu.iota {dimensions = array<i32: 0>} : vector<16x16xi32>
    %27 = vector.broadcast %25 : i32 to vector<16x16xi32>
    %28 = arith.addi %27, %26 : vector<16x16xi32>
    %c16_i32_11 = arith.constant 16 : i32
    %29 = vector.broadcast %c16_i32_11 : i32 to vector<16x16xi32>
    %30 = arith.cmpi slt, %24, %29 : vector<16x16xi32>
    %c16_i32_12 = arith.constant 16 : i32
    %31 = vector.broadcast %c16_i32_12 : i32 to vector<16x16xi32>
    %32 = arith.cmpi slt, %28, %31 : vector<16x16xi32>
    %33 = arith.andi %30, %32 : vector<16x16xi1>
    %34 = arith.cmpi ne, %24, %28 : vector<16x16xi32>
    %35 = arith.andi %23, %34 : vector<16x16xi1>
    %36 = arith.andi %35, %33 : vector<16x16xi1>
    %cst_13 = arith.constant dense<true> : vector<16x16xi1>
    %37 = arith.xori %23, %cst_13 : vector<16x16xi1>
    %38 = arith.andi %37, %33 : vector<16x16xi1>
    %cst_14 = arith.constant 0xFF800000 : f32
    %39 = vector.broadcast %cst_14 : f32 to vector<16x16xf32>
    %40 = arith.select %38, %18, %39 : vector<16x16xi1>, vector<16x16xf32>
    %cst_15 = arith.constant dense<0xFF800000> : vector<16xf32>
    %41 = vector.multi_reduction <maximumf>, %40, %cst_15 [1] : vector<16x16xf32> to vector<16xf32>
    %42 = vector.shape_cast %41 : vector<16xf32> to vector<16x1xf32>
    %cst_16 = arith.constant 0x7F800000 : f32
    %43 = vector.broadcast %cst_16 : f32 to vector<16x16xf32>
    %44 = arith.select %36, %18, %43 : vector<16x16xi1>, vector<16x16xf32>
    %cst_17 = arith.constant dense<0x7F800000> : vector<16xf32>
    %45 = vector.multi_reduction <minimumf>, %44, %cst_17 [1] : vector<16x16xf32> to vector<16xf32>
    %46 = vector.shape_cast %45 : vector<16xf32> to vector<16x1xf32>
    %cst_18 = arith.constant 1.000000e-01 : f32
    %47 = vector.broadcast %cst_18 : f32 to vector<16x16xf32>
    %48 = arith.subf %18, %47 : vector<16x16xf32>
    %49 = vector.broadcast %42 : vector<16x1xf32> to vector<16x16xf32>
    %50 = arith.cmpf olt, %48, %49 : vector<16x16xf32>
    %51 = arith.andi %36, %50 : vector<16x16xi1>
    %cst_19 = arith.constant 1.000000e-01 : f32
    %52 = vector.broadcast %cst_19 : f32 to vector<16x16xf32>
    %53 = arith.addf %18, %52 : vector<16x16xf32>
    %54 = vector.broadcast %46 : vector<16x1xf32> to vector<16x16xf32>
    %55 = arith.cmpf ogt, %53, %54 : vector<16x16xf32>
    %56 = arith.andi %38, %55 : vector<16x16xi1>
    %cst_20 = arith.constant 0x7F800000 : f32
    %57 = vector.broadcast %cst_20 : f32 to vector<16x16xf32>
    %58 = arith.select %51, %18, %57 : vector<16x16xi1>, vector<16x16xf32>
    %cst_21 = arith.constant 0xFF800000 : f32
    %59 = vector.broadcast %cst_21 : f32 to vector<16x16xf32>
    %60 = arith.select %56, %18, %59 : vector<16x16xi1>, vector<16x16xf32>
    %cst_22 = arith.constant 0.000000e+00 : f32
    %61 = vector.broadcast %cst_22 : f32 to vector<16x16xf32>
    %cst_23 = arith.constant 0xFF800000 : f32
    %c0_i32 = arith.constant 0 : i32
    %62 = vector.broadcast %c0_i32 : i32 to vector<16x16xi32>
    %63 = arith.cmpi eq, %24, %62 : vector<16x16xi32>
    %64 = vector.broadcast %cst_23 : f32 to vector<16x16xf32>
    %65 = arith.select %63, %58, %64 : vector<16x16xi1>, vector<16x16xf32>
    %cst_24 = arith.constant dense<0xFF800000> : vector<16xf32>
    %66 = vector.multi_reduction <maximumf>, %65, %cst_24 [1] : vector<16x16xf32> to vector<16xf32>
    %67 = vector.shape_cast %66 : vector<16xf32> to vector<16x1xf32>
    %68 = vector.broadcast %67 : vector<16x1xf32> to vector<16x16xf32>
    %69 = arith.subf %60, %68 : vector<16x16xf32>
    %cst_25 = arith.constant 2.000000e-01 : f32
    %70 = vector.broadcast %cst_25 : f32 to vector<16x16xf32>
    %71 = arith.addf %69, %70 : vector<16x16xf32>
    %cst_26 = arith.constant 0.000000e+00 : f32
    %72 = vector.broadcast %cst_26 : f32 to vector<16x16xf32>
    %73 = arith.cmpf ogt, %71, %72 : vector<16x16xf32>
    %cst_27 = arith.constant 0.000000e+00 : f32
    %74 = vector.broadcast %cst_27 : f32 to vector<16x16xf32>
    %75 = arith.select %73, %71, %74 : vector<16x16xi1>, vector<16x16xf32>
    %76 = arith.addf %61, %75 : vector<16x16xf32>
    %77 = arith.extui %73 : vector<16x16xi1> to vector<16x16xi32>
    %78 = arith.sitofp %77 : vector<16x16xi32> to vector<16x16xf32>
    %79 = arith.addf %61, %78 : vector<16x16xf32>
    %c1_i32 = arith.constant 1 : i32
    %80 = vector.broadcast %c1_i32 : i32 to vector<16x16xi32>
    %81 = arith.cmpi eq, %24, %80 : vector<16x16xi32>
    %82 = vector.broadcast %cst_23 : f32 to vector<16x16xf32>
    %83 = arith.select %81, %58, %82 : vector<16x16xi1>, vector<16x16xf32>
    %cst_28 = arith.constant dense<0xFF800000> : vector<16xf32>
    %84 = vector.multi_reduction <maximumf>, %83, %cst_28 [1] : vector<16x16xf32> to vector<16xf32>
    %85 = vector.shape_cast %84 : vector<16xf32> to vector<16x1xf32>
    %86 = vector.broadcast %85 : vector<16x1xf32> to vector<16x16xf32>
    %87 = arith.subf %60, %86 : vector<16x16xf32>
    %cst_29 = arith.constant 2.000000e-01 : f32
    %88 = vector.broadcast %cst_29 : f32 to vector<16x16xf32>
    %89 = arith.addf %87, %88 : vector<16x16xf32>
    %cst_30 = arith.constant 0.000000e+00 : f32
    %90 = vector.broadcast %cst_30 : f32 to vector<16x16xf32>
    %91 = arith.cmpf ogt, %89, %90 : vector<16x16xf32>
    %cst_31 = arith.constant 0.000000e+00 : f32
    %92 = vector.broadcast %cst_31 : f32 to vector<16x16xf32>
    %93 = arith.select %91, %89, %92 : vector<16x16xi1>, vector<16x16xf32>
    %94 = arith.addf %76, %93 : vector<16x16xf32>
    %95 = arith.extui %91 : vector<16x16xi1> to vector<16x16xi32>
    %96 = arith.sitofp %95 : vector<16x16xi32> to vector<16x16xf32>
    %97 = arith.addf %79, %96 : vector<16x16xf32>
    %c2_i32 = arith.constant 2 : i32
    %98 = vector.broadcast %c2_i32 : i32 to vector<16x16xi32>
    %99 = arith.cmpi eq, %24, %98 : vector<16x16xi32>
    %100 = vector.broadcast %cst_23 : f32 to vector<16x16xf32>
    %101 = arith.select %99, %58, %100 : vector<16x16xi1>, vector<16x16xf32>
    %cst_32 = arith.constant dense<0xFF800000> : vector<16xf32>
    %102 = vector.multi_reduction <maximumf>, %101, %cst_32 [1] : vector<16x16xf32> to vector<16xf32>
    %103 = vector.shape_cast %102 : vector<16xf32> to vector<16x1xf32>
    %104 = vector.broadcast %103 : vector<16x1xf32> to vector<16x16xf32>
    %105 = arith.subf %60, %104 : vector<16x16xf32>
    %cst_33 = arith.constant 2.000000e-01 : f32
    %106 = vector.broadcast %cst_33 : f32 to vector<16x16xf32>
    %107 = arith.addf %105, %106 : vector<16x16xf32>
    %cst_34 = arith.constant 0.000000e+00 : f32
    %108 = vector.broadcast %cst_34 : f32 to vector<16x16xf32>
    %109 = arith.cmpf ogt, %107, %108 : vector<16x16xf32>
    %cst_35 = arith.constant 0.000000e+00 : f32
    %110 = vector.broadcast %cst_35 : f32 to vector<16x16xf32>
    %111 = arith.select %109, %107, %110 : vector<16x16xi1>, vector<16x16xf32>
    %112 = arith.addf %94, %111 : vector<16x16xf32>
    %113 = arith.extui %109 : vector<16x16xi1> to vector<16x16xi32>
    %114 = arith.sitofp %113 : vector<16x16xi32> to vector<16x16xf32>
    %115 = arith.addf %97, %114 : vector<16x16xf32>
    %c3_i32 = arith.constant 3 : i32
    %116 = vector.broadcast %c3_i32 : i32 to vector<16x16xi32>
    %117 = arith.cmpi eq, %24, %116 : vector<16x16xi32>
    %118 = vector.broadcast %cst_23 : f32 to vector<16x16xf32>
    %119 = arith.select %117, %58, %118 : vector<16x16xi1>, vector<16x16xf32>
    %cst_36 = arith.constant dense<0xFF800000> : vector<16xf32>
    %120 = vector.multi_reduction <maximumf>, %119, %cst_36 [1] : vector<16x16xf32> to vector<16xf32>
    %121 = vector.shape_cast %120 : vector<16xf32> to vector<16x1xf32>
    %122 = vector.broadcast %121 : vector<16x1xf32> to vector<16x16xf32>
    %123 = arith.subf %60, %122 : vector<16x16xf32>
    %cst_37 = arith.constant 2.000000e-01 : f32
    %124 = vector.broadcast %cst_37 : f32 to vector<16x16xf32>
    %125 = arith.addf %123, %124 : vector<16x16xf32>
    %cst_38 = arith.constant 0.000000e+00 : f32
    %126 = vector.broadcast %cst_38 : f32 to vector<16x16xf32>
    %127 = arith.cmpf ogt, %125, %126 : vector<16x16xf32>
    %cst_39 = arith.constant 0.000000e+00 : f32
    %128 = vector.broadcast %cst_39 : f32 to vector<16x16xf32>
    %129 = arith.select %127, %125, %128 : vector<16x16xi1>, vector<16x16xf32>
    %130 = arith.addf %112, %129 : vector<16x16xf32>
    %131 = arith.extui %127 : vector<16x16xi1> to vector<16x16xi32>
    %132 = arith.sitofp %131 : vector<16x16xi32> to vector<16x16xf32>
    %133 = arith.addf %115, %132 : vector<16x16xf32>
    %c4_i32 = arith.constant 4 : i32
    %134 = vector.broadcast %c4_i32 : i32 to vector<16x16xi32>
    %135 = arith.cmpi eq, %24, %134 : vector<16x16xi32>
    %136 = vector.broadcast %cst_23 : f32 to vector<16x16xf32>
    %137 = arith.select %135, %58, %136 : vector<16x16xi1>, vector<16x16xf32>
    %cst_40 = arith.constant dense<0xFF800000> : vector<16xf32>
    %138 = vector.multi_reduction <maximumf>, %137, %cst_40 [1] : vector<16x16xf32> to vector<16xf32>
    %139 = vector.shape_cast %138 : vector<16xf32> to vector<16x1xf32>
    %140 = vector.broadcast %139 : vector<16x1xf32> to vector<16x16xf32>
    %141 = arith.subf %60, %140 : vector<16x16xf32>
    %cst_41 = arith.constant 2.000000e-01 : f32
    %142 = vector.broadcast %cst_41 : f32 to vector<16x16xf32>
    %143 = arith.addf %141, %142 : vector<16x16xf32>
    %cst_42 = arith.constant 0.000000e+00 : f32
    %144 = vector.broadcast %cst_42 : f32 to vector<16x16xf32>
    %145 = arith.cmpf ogt, %143, %144 : vector<16x16xf32>
    %cst_43 = arith.constant 0.000000e+00 : f32
    %146 = vector.broadcast %cst_43 : f32 to vector<16x16xf32>
    %147 = arith.select %145, %143, %146 : vector<16x16xi1>, vector<16x16xf32>
    %148 = arith.addf %130, %147 : vector<16x16xf32>
    %149 = arith.extui %145 : vector<16x16xi1> to vector<16x16xi32>
    %150 = arith.sitofp %149 : vector<16x16xi32> to vector<16x16xf32>
    %151 = arith.addf %133, %150 : vector<16x16xf32>
    %c5_i32 = arith.constant 5 : i32
    %152 = vector.broadcast %c5_i32 : i32 to vector<16x16xi32>
    %153 = arith.cmpi eq, %24, %152 : vector<16x16xi32>
    %154 = vector.broadcast %cst_23 : f32 to vector<16x16xf32>
    %155 = arith.select %153, %58, %154 : vector<16x16xi1>, vector<16x16xf32>
    %cst_44 = arith.constant dense<0xFF800000> : vector<16xf32>
    %156 = vector.multi_reduction <maximumf>, %155, %cst_44 [1] : vector<16x16xf32> to vector<16xf32>
    %157 = vector.shape_cast %156 : vector<16xf32> to vector<16x1xf32>
    %158 = vector.broadcast %157 : vector<16x1xf32> to vector<16x16xf32>
    %159 = arith.subf %60, %158 : vector<16x16xf32>
    %cst_45 = arith.constant 2.000000e-01 : f32
    %160 = vector.broadcast %cst_45 : f32 to vector<16x16xf32>
    %161 = arith.addf %159, %160 : vector<16x16xf32>
    %cst_46 = arith.constant 0.000000e+00 : f32
    %162 = vector.broadcast %cst_46 : f32 to vector<16x16xf32>
    %163 = arith.cmpf ogt, %161, %162 : vector<16x16xf32>
    %cst_47 = arith.constant 0.000000e+00 : f32
    %164 = vector.broadcast %cst_47 : f32 to vector<16x16xf32>
    %165 = arith.select %163, %161, %164 : vector<16x16xi1>, vector<16x16xf32>
    %166 = arith.addf %148, %165 : vector<16x16xf32>
    %167 = arith.extui %163 : vector<16x16xi1> to vector<16x16xi32>
    %168 = arith.sitofp %167 : vector<16x16xi32> to vector<16x16xf32>
    %169 = arith.addf %151, %168 : vector<16x16xf32>
    %c6_i32 = arith.constant 6 : i32
    %170 = vector.broadcast %c6_i32 : i32 to vector<16x16xi32>
    %171 = arith.cmpi eq, %24, %170 : vector<16x16xi32>
    %172 = vector.broadcast %cst_23 : f32 to vector<16x16xf32>
    %173 = arith.select %171, %58, %172 : vector<16x16xi1>, vector<16x16xf32>
    %cst_48 = arith.constant dense<0xFF800000> : vector<16xf32>
    %174 = vector.multi_reduction <maximumf>, %173, %cst_48 [1] : vector<16x16xf32> to vector<16xf32>
    %175 = vector.shape_cast %174 : vector<16xf32> to vector<16x1xf32>
    %176 = vector.broadcast %175 : vector<16x1xf32> to vector<16x16xf32>
    %177 = arith.subf %60, %176 : vector<16x16xf32>
    %cst_49 = arith.constant 2.000000e-01 : f32
    %178 = vector.broadcast %cst_49 : f32 to vector<16x16xf32>
    %179 = arith.addf %177, %178 : vector<16x16xf32>
    %cst_50 = arith.constant 0.000000e+00 : f32
    %180 = vector.broadcast %cst_50 : f32 to vector<16x16xf32>
    %181 = arith.cmpf ogt, %179, %180 : vector<16x16xf32>
    %cst_51 = arith.constant 0.000000e+00 : f32
    %182 = vector.broadcast %cst_51 : f32 to vector<16x16xf32>
    %183 = arith.select %181, %179, %182 : vector<16x16xi1>, vector<16x16xf32>
    %184 = arith.addf %166, %183 : vector<16x16xf32>
    %185 = arith.extui %181 : vector<16x16xi1> to vector<16x16xi32>
    %186 = arith.sitofp %185 : vector<16x16xi32> to vector<16x16xf32>
    %187 = arith.addf %169, %186 : vector<16x16xf32>
    %c7_i32 = arith.constant 7 : i32
    %188 = vector.broadcast %c7_i32 : i32 to vector<16x16xi32>
    %189 = arith.cmpi eq, %24, %188 : vector<16x16xi32>
    %190 = vector.broadcast %cst_23 : f32 to vector<16x16xf32>
    %191 = arith.select %189, %58, %190 : vector<16x16xi1>, vector<16x16xf32>
    %cst_52 = arith.constant dense<0xFF800000> : vector<16xf32>
    %192 = vector.multi_reduction <maximumf>, %191, %cst_52 [1] : vector<16x16xf32> to vector<16xf32>
    %193 = vector.shape_cast %192 : vector<16xf32> to vector<16x1xf32>
    %194 = vector.broadcast %193 : vector<16x1xf32> to vector<16x16xf32>
    %195 = arith.subf %60, %194 : vector<16x16xf32>
    %cst_53 = arith.constant 2.000000e-01 : f32
    %196 = vector.broadcast %cst_53 : f32 to vector<16x16xf32>
    %197 = arith.addf %195, %196 : vector<16x16xf32>
    %cst_54 = arith.constant 0.000000e+00 : f32
    %198 = vector.broadcast %cst_54 : f32 to vector<16x16xf32>
    %199 = arith.cmpf ogt, %197, %198 : vector<16x16xf32>
    %cst_55 = arith.constant 0.000000e+00 : f32
    %200 = vector.broadcast %cst_55 : f32 to vector<16x16xf32>
    %201 = arith.select %199, %197, %200 : vector<16x16xi1>, vector<16x16xf32>
    %202 = arith.addf %184, %201 : vector<16x16xf32>
    %203 = arith.extui %199 : vector<16x16xi1> to vector<16x16xi32>
    %204 = arith.sitofp %203 : vector<16x16xi32> to vector<16x16xf32>
    %205 = arith.addf %187, %204 : vector<16x16xf32>
    %c8_i32 = arith.constant 8 : i32
    %206 = vector.broadcast %c8_i32 : i32 to vector<16x16xi32>
    %207 = arith.cmpi eq, %24, %206 : vector<16x16xi32>
    %208 = vector.broadcast %cst_23 : f32 to vector<16x16xf32>
    %209 = arith.select %207, %58, %208 : vector<16x16xi1>, vector<16x16xf32>
    %cst_56 = arith.constant dense<0xFF800000> : vector<16xf32>
    %210 = vector.multi_reduction <maximumf>, %209, %cst_56 [1] : vector<16x16xf32> to vector<16xf32>
    %211 = vector.shape_cast %210 : vector<16xf32> to vector<16x1xf32>
    %212 = vector.broadcast %211 : vector<16x1xf32> to vector<16x16xf32>
    %213 = arith.subf %60, %212 : vector<16x16xf32>
    %cst_57 = arith.constant 2.000000e-01 : f32
    %214 = vector.broadcast %cst_57 : f32 to vector<16x16xf32>
    %215 = arith.addf %213, %214 : vector<16x16xf32>
    %cst_58 = arith.constant 0.000000e+00 : f32
    %216 = vector.broadcast %cst_58 : f32 to vector<16x16xf32>
    %217 = arith.cmpf ogt, %215, %216 : vector<16x16xf32>
    %cst_59 = arith.constant 0.000000e+00 : f32
    %218 = vector.broadcast %cst_59 : f32 to vector<16x16xf32>
    %219 = arith.select %217, %215, %218 : vector<16x16xi1>, vector<16x16xf32>
    %220 = arith.addf %202, %219 : vector<16x16xf32>
    %221 = arith.extui %217 : vector<16x16xi1> to vector<16x16xi32>
    %222 = arith.sitofp %221 : vector<16x16xi32> to vector<16x16xf32>
    %223 = arith.addf %205, %222 : vector<16x16xf32>
    %c9_i32 = arith.constant 9 : i32
    %224 = vector.broadcast %c9_i32 : i32 to vector<16x16xi32>
    %225 = arith.cmpi eq, %24, %224 : vector<16x16xi32>
    %226 = vector.broadcast %cst_23 : f32 to vector<16x16xf32>
    %227 = arith.select %225, %58, %226 : vector<16x16xi1>, vector<16x16xf32>
    %cst_60 = arith.constant dense<0xFF800000> : vector<16xf32>
    %228 = vector.multi_reduction <maximumf>, %227, %cst_60 [1] : vector<16x16xf32> to vector<16xf32>
    %229 = vector.shape_cast %228 : vector<16xf32> to vector<16x1xf32>
    %230 = vector.broadcast %229 : vector<16x1xf32> to vector<16x16xf32>
    %231 = arith.subf %60, %230 : vector<16x16xf32>
    %cst_61 = arith.constant 2.000000e-01 : f32
    %232 = vector.broadcast %cst_61 : f32 to vector<16x16xf32>
    %233 = arith.addf %231, %232 : vector<16x16xf32>
    %cst_62 = arith.constant 0.000000e+00 : f32
    %234 = vector.broadcast %cst_62 : f32 to vector<16x16xf32>
    %235 = arith.cmpf ogt, %233, %234 : vector<16x16xf32>
    %cst_63 = arith.constant 0.000000e+00 : f32
    %236 = vector.broadcast %cst_63 : f32 to vector<16x16xf32>
    %237 = arith.select %235, %233, %236 : vector<16x16xi1>, vector<16x16xf32>
    %238 = arith.addf %220, %237 : vector<16x16xf32>
    %239 = arith.extui %235 : vector<16x16xi1> to vector<16x16xi32>
    %240 = arith.sitofp %239 : vector<16x16xi32> to vector<16x16xf32>
    %241 = arith.addf %223, %240 : vector<16x16xf32>
    %c10_i32 = arith.constant 10 : i32
    %242 = vector.broadcast %c10_i32 : i32 to vector<16x16xi32>
    %243 = arith.cmpi eq, %24, %242 : vector<16x16xi32>
    %244 = vector.broadcast %cst_23 : f32 to vector<16x16xf32>
    %245 = arith.select %243, %58, %244 : vector<16x16xi1>, vector<16x16xf32>
    %cst_64 = arith.constant dense<0xFF800000> : vector<16xf32>
    %246 = vector.multi_reduction <maximumf>, %245, %cst_64 [1] : vector<16x16xf32> to vector<16xf32>
    %247 = vector.shape_cast %246 : vector<16xf32> to vector<16x1xf32>
    %248 = vector.broadcast %247 : vector<16x1xf32> to vector<16x16xf32>
    %249 = arith.subf %60, %248 : vector<16x16xf32>
    %cst_65 = arith.constant 2.000000e-01 : f32
    %250 = vector.broadcast %cst_65 : f32 to vector<16x16xf32>
    %251 = arith.addf %249, %250 : vector<16x16xf32>
    %cst_66 = arith.constant 0.000000e+00 : f32
    %252 = vector.broadcast %cst_66 : f32 to vector<16x16xf32>
    %253 = arith.cmpf ogt, %251, %252 : vector<16x16xf32>
    %cst_67 = arith.constant 0.000000e+00 : f32
    %254 = vector.broadcast %cst_67 : f32 to vector<16x16xf32>
    %255 = arith.select %253, %251, %254 : vector<16x16xi1>, vector<16x16xf32>
    %256 = arith.addf %238, %255 : vector<16x16xf32>
    %257 = arith.extui %253 : vector<16x16xi1> to vector<16x16xi32>
    %258 = arith.sitofp %257 : vector<16x16xi32> to vector<16x16xf32>
    %259 = arith.addf %241, %258 : vector<16x16xf32>
    %c11_i32 = arith.constant 11 : i32
    %260 = vector.broadcast %c11_i32 : i32 to vector<16x16xi32>
    %261 = arith.cmpi eq, %24, %260 : vector<16x16xi32>
    %262 = vector.broadcast %cst_23 : f32 to vector<16x16xf32>
    %263 = arith.select %261, %58, %262 : vector<16x16xi1>, vector<16x16xf32>
    %cst_68 = arith.constant dense<0xFF800000> : vector<16xf32>
    %264 = vector.multi_reduction <maximumf>, %263, %cst_68 [1] : vector<16x16xf32> to vector<16xf32>
    %265 = vector.shape_cast %264 : vector<16xf32> to vector<16x1xf32>
    %266 = vector.broadcast %265 : vector<16x1xf32> to vector<16x16xf32>
    %267 = arith.subf %60, %266 : vector<16x16xf32>
    %cst_69 = arith.constant 2.000000e-01 : f32
    %268 = vector.broadcast %cst_69 : f32 to vector<16x16xf32>
    %269 = arith.addf %267, %268 : vector<16x16xf32>
    %cst_70 = arith.constant 0.000000e+00 : f32
    %270 = vector.broadcast %cst_70 : f32 to vector<16x16xf32>
    %271 = arith.cmpf ogt, %269, %270 : vector<16x16xf32>
    %cst_71 = arith.constant 0.000000e+00 : f32
    %272 = vector.broadcast %cst_71 : f32 to vector<16x16xf32>
    %273 = arith.select %271, %269, %272 : vector<16x16xi1>, vector<16x16xf32>
    %274 = arith.addf %256, %273 : vector<16x16xf32>
    %275 = arith.extui %271 : vector<16x16xi1> to vector<16x16xi32>
    %276 = arith.sitofp %275 : vector<16x16xi32> to vector<16x16xf32>
    %277 = arith.addf %259, %276 : vector<16x16xf32>
    %c12_i32 = arith.constant 12 : i32
    %278 = vector.broadcast %c12_i32 : i32 to vector<16x16xi32>
    %279 = arith.cmpi eq, %24, %278 : vector<16x16xi32>
    %280 = vector.broadcast %cst_23 : f32 to vector<16x16xf32>
    %281 = arith.select %279, %58, %280 : vector<16x16xi1>, vector<16x16xf32>
    %cst_72 = arith.constant dense<0xFF800000> : vector<16xf32>
    %282 = vector.multi_reduction <maximumf>, %281, %cst_72 [1] : vector<16x16xf32> to vector<16xf32>
    %283 = vector.shape_cast %282 : vector<16xf32> to vector<16x1xf32>
    %284 = vector.broadcast %283 : vector<16x1xf32> to vector<16x16xf32>
    %285 = arith.subf %60, %284 : vector<16x16xf32>
    %cst_73 = arith.constant 2.000000e-01 : f32
    %286 = vector.broadcast %cst_73 : f32 to vector<16x16xf32>
    %287 = arith.addf %285, %286 : vector<16x16xf32>
    %cst_74 = arith.constant 0.000000e+00 : f32
    %288 = vector.broadcast %cst_74 : f32 to vector<16x16xf32>
    %289 = arith.cmpf ogt, %287, %288 : vector<16x16xf32>
    %cst_75 = arith.constant 0.000000e+00 : f32
    %290 = vector.broadcast %cst_75 : f32 to vector<16x16xf32>
    %291 = arith.select %289, %287, %290 : vector<16x16xi1>, vector<16x16xf32>
    %292 = arith.addf %274, %291 : vector<16x16xf32>
    %293 = arith.extui %289 : vector<16x16xi1> to vector<16x16xi32>
    %294 = arith.sitofp %293 : vector<16x16xi32> to vector<16x16xf32>
    %295 = arith.addf %277, %294 : vector<16x16xf32>
    %c13_i32 = arith.constant 13 : i32
    %296 = vector.broadcast %c13_i32 : i32 to vector<16x16xi32>
    %297 = arith.cmpi eq, %24, %296 : vector<16x16xi32>
    %298 = vector.broadcast %cst_23 : f32 to vector<16x16xf32>
    %299 = arith.select %297, %58, %298 : vector<16x16xi1>, vector<16x16xf32>
    %cst_76 = arith.constant dense<0xFF800000> : vector<16xf32>
    %300 = vector.multi_reduction <maximumf>, %299, %cst_76 [1] : vector<16x16xf32> to vector<16xf32>
    %301 = vector.shape_cast %300 : vector<16xf32> to vector<16x1xf32>
    %302 = vector.broadcast %301 : vector<16x1xf32> to vector<16x16xf32>
    %303 = arith.subf %60, %302 : vector<16x16xf32>
    %cst_77 = arith.constant 2.000000e-01 : f32
    %304 = vector.broadcast %cst_77 : f32 to vector<16x16xf32>
    %305 = arith.addf %303, %304 : vector<16x16xf32>
    %cst_78 = arith.constant 0.000000e+00 : f32
    %306 = vector.broadcast %cst_78 : f32 to vector<16x16xf32>
    %307 = arith.cmpf ogt, %305, %306 : vector<16x16xf32>
    %cst_79 = arith.constant 0.000000e+00 : f32
    %308 = vector.broadcast %cst_79 : f32 to vector<16x16xf32>
    %309 = arith.select %307, %305, %308 : vector<16x16xi1>, vector<16x16xf32>
    %310 = arith.addf %292, %309 : vector<16x16xf32>
    %311 = arith.extui %307 : vector<16x16xi1> to vector<16x16xi32>
    %312 = arith.sitofp %311 : vector<16x16xi32> to vector<16x16xf32>
    %313 = arith.addf %295, %312 : vector<16x16xf32>
    %c14_i32 = arith.constant 14 : i32
    %314 = vector.broadcast %c14_i32 : i32 to vector<16x16xi32>
    %315 = arith.cmpi eq, %24, %314 : vector<16x16xi32>
    %316 = vector.broadcast %cst_23 : f32 to vector<16x16xf32>
    %317 = arith.select %315, %58, %316 : vector<16x16xi1>, vector<16x16xf32>
    %cst_80 = arith.constant dense<0xFF800000> : vector<16xf32>
    %318 = vector.multi_reduction <maximumf>, %317, %cst_80 [1] : vector<16x16xf32> to vector<16xf32>
    %319 = vector.shape_cast %318 : vector<16xf32> to vector<16x1xf32>
    %320 = vector.broadcast %319 : vector<16x1xf32> to vector<16x16xf32>
    %321 = arith.subf %60, %320 : vector<16x16xf32>
    %cst_81 = arith.constant 2.000000e-01 : f32
    %322 = vector.broadcast %cst_81 : f32 to vector<16x16xf32>
    %323 = arith.addf %321, %322 : vector<16x16xf32>
    %cst_82 = arith.constant 0.000000e+00 : f32
    %324 = vector.broadcast %cst_82 : f32 to vector<16x16xf32>
    %325 = arith.cmpf ogt, %323, %324 : vector<16x16xf32>
    %cst_83 = arith.constant 0.000000e+00 : f32
    %326 = vector.broadcast %cst_83 : f32 to vector<16x16xf32>
    %327 = arith.select %325, %323, %326 : vector<16x16xi1>, vector<16x16xf32>
    %328 = arith.addf %310, %327 : vector<16x16xf32>
    %329 = arith.extui %325 : vector<16x16xi1> to vector<16x16xi32>
    %330 = arith.sitofp %329 : vector<16x16xi32> to vector<16x16xf32>
    %331 = arith.addf %313, %330 : vector<16x16xf32>
    %c15_i32 = arith.constant 15 : i32
    %332 = vector.broadcast %c15_i32 : i32 to vector<16x16xi32>
    %333 = arith.cmpi eq, %24, %332 : vector<16x16xi32>
    %334 = vector.broadcast %cst_23 : f32 to vector<16x16xf32>
    %335 = arith.select %333, %58, %334 : vector<16x16xi1>, vector<16x16xf32>
    %cst_84 = arith.constant dense<0xFF800000> : vector<16xf32>
    %336 = vector.multi_reduction <maximumf>, %335, %cst_84 [1] : vector<16x16xf32> to vector<16xf32>
    %337 = vector.shape_cast %336 : vector<16xf32> to vector<16x1xf32>
    %338 = vector.broadcast %337 : vector<16x1xf32> to vector<16x16xf32>
    %339 = arith.subf %60, %338 : vector<16x16xf32>
    %cst_85 = arith.constant 2.000000e-01 : f32
    %340 = vector.broadcast %cst_85 : f32 to vector<16x16xf32>
    %341 = arith.addf %339, %340 : vector<16x16xf32>
    %cst_86 = arith.constant 0.000000e+00 : f32
    %342 = vector.broadcast %cst_86 : f32 to vector<16x16xf32>
    %343 = arith.cmpf ogt, %341, %342 : vector<16x16xf32>
    %cst_87 = arith.constant 0.000000e+00 : f32
    %344 = vector.broadcast %cst_87 : f32 to vector<16x16xf32>
    %345 = arith.select %343, %341, %344 : vector<16x16xi1>, vector<16x16xf32>
    %346 = arith.addf %328, %345 : vector<16x16xf32>
    %347 = arith.extui %343 : vector<16x16xi1> to vector<16x16xi32>
    %348 = arith.sitofp %347 : vector<16x16xi32> to vector<16x16xf32>
    %349 = arith.addf %331, %348 : vector<16x16xf32>
    %c16_i32_88 = arith.constant 16 : i32
    %350 = vector.shape_cast %346 : vector<16x16xf32> to vector<1x16x16xf32>
    %cst_89 = arith.constant dense<0.000000e+00> : vector<1xf32>
    %351 = vector.multi_reduction <add>, %350, %cst_89 [1, 2] : vector<1x16x16xf32> to vector<1xf32>
    %352 = vector.shape_cast %351 : vector<1xf32> to vector<1x1x1xf32>
    %353 = vector.extract %352[0, 0, 0] : f32 from vector<1x1x1xf32>
    %354 = vector.shape_cast %349 : vector<16x16xf32> to vector<1x16x16xf32>
    %cst_90 = arith.constant dense<0.000000e+00> : vector<1xf32>
    %355 = vector.multi_reduction <add>, %354, %cst_90 [1, 2] : vector<1x16x16xf32> to vector<1xf32>
    %356 = vector.shape_cast %355 : vector<1xf32> to vector<1x1x1xf32>
    %357 = vector.extract %356[0, 0, 0] : f32 from vector<1x1x1xf32>
    %358 = vector.broadcast %353 : f32 to vector<1x8x128xf32>
    %c0_91 = arith.constant 0 : index
    %c0_92 = arith.constant 0 : index
    %c0_93 = arith.constant 0 : index
    %359 = vector.load %arg5[%c0_91, %c0_92, %c0_93] : memref<1x8x128xf32, #tpu.memory_space<vmem>>, vector<1x8x128xf32>
    tpu.vector_store %arg5[%c0_91, %c0_92, %c0_93], %358 {strides = array<i32>} : memref<1x8x128xf32, #tpu.memory_space<vmem>>, vector<1x8x128xf32>,
    %360 = vector.broadcast %357 : f32 to vector<1x8x128xf32>
    %c0_94 = arith.constant 0 : index
    %c0_95 = arith.constant 0 : index
    %c0_96 = arith.constant 0 : index
    %361 = vector.load %arg6[%c0_94, %c0_95, %c0_96] : memref<1x8x128xf32, #tpu.memory_space<vmem>>, vector<1x8x128xf32>
    tpu.vector_store %arg6[%c0_94, %c0_95, %c0_96], %360 {strides = array<i32>} : memref<1x8x128xf32, #tpu.memory_space<vmem>>, vector<1x8x128xf32>,
    return
  }
  func.func @transform_0(%arg0: i32) -> (i32, i32) {
    %c0_i32 = arith.constant 0 : i32
    %c0_i32_0 = arith.constant 0 : i32
    %c0_i32_1 = arith.constant 0 : i32
    return %c0_i32, %c0_i32_0 : i32, i32
  }
  func.func @transform_1(%arg0: i32) -> (i32, i32) {
    %c0_i32 = arith.constant 0 : i32
    %c0_i32_0 = arith.constant 0 : i32
    return %arg0, %c0_i32 : i32, i32
  }
  func.func @transform_2(%arg0: i32) -> (i32, i32) {
    %c0_i32 = arith.constant 0 : i32
    %c0_i32_0 = arith.constant 0 : i32
    %c0_i32_1 = arith.constant 0 : i32
    return %c0_i32, %c0_i32_0 : i32, i32
  }
  func.func @transform_3(%arg0: i32) -> (i32, i32) {
    %c0_i32 = arith.constant 0 : i32
    %c0_i32_0 = arith.constant 0 : i32
    return %arg0, %c0_i32 : i32, i32
  }
  func.func @transform_4(%arg0: i32) -> (i32, i32, i32) {
    %c0_i32 = arith.constant 0 : i32
    %c0_i32_0 = arith.constant 0 : i32
    %c0_i32_1 = arith.constant 0 : i32
    return %arg0, %c0_i32, %c0_i32_0 : i32, i32, i32
  }
  func.func @transform_5(%arg0: i32) -> (i32, i32, i32) {
    %c0_i32 = arith.constant 0 : i32
    %c0_i32_0 = arith.constant 0 : i32
    %c0_i32_1 = arith.constant 0 : i32
    return %arg0, %c0_i32, %c0_i32_0 : i32, i32, i32
  }
}

</mosaic_0001>

<bundles_post_ra>
// kernel: triplet_margin_loss.1
= control target key start
LH: loop header
LB: loop body
LE: loop exit
PB: predicated region body
PF: predicated region fallthrough
CT: control target
= control target key end

     0   :  { %vm23_vm0 = vcmask 261120   ;;  %v758_v50 = vmov 0   ;;  %s1195_s1 = inlined_call_operand.vmem [shape: f32[16,32], index: 1, kind: input, shape index: {}, may-alias: {0,1}]   ;;  %s1196_s0 = inlined_call_operand.vmem [shape: f32[16,32], index: 0, kind: input, shape index: {}, may-alias: {0,1}]   ;;  %s1197_s2 = inlined_call_operand.vmem [shape: s32[1,16], index: 2, kind: input, shape index: {}]   ;;  %s1198_s3 = inlined_call_operand.vmem [shape: s32[16,1], index: 3, kind: input, shape index: {}]   ;;  %s1199_s4 = inlined_call_operand.vmem [shape: f32[1,8,128], index: 4, kind: output, shape index: {0}]   ;;  %s1200_s5 = inlined_call_operand.vmem [shape: f32[1,8,128], index: 5, kind: output, shape index: {1}]  }
   0x1   :  { %v794_v0 = vld [vmem:[%s1195_s1] sm:$0xff]  ;;  %v799_v1 = vld [vmem:[%s1196_s0 + $0x8] sm:$0xff]  ;;  %739 = vset.pattern.permute.xlu2 %v758_v50  ;;  %740 = vset.pattern.permute.xlu0 %v758_v50 }
   0x2   :  { %v88_v2 = vmul.f32 %v794_v0, %v794_v0  ;;  %v22_v3 = vmul.f32 %v799_v1, %v799_v1  ;;  %v808_v4 = vld [vmem:[%s1195_s1 + $0x8] sm:$0xff]  ;;  %v813_v5 = vld [vmem:[%s1196_s0] sm:$0xff] }
   0x3   :  { %v89_v8 = vmul.f32 %v808_v4, %v808_v4  ;;  %v21_v9 = vmul.f32 %v813_v5, %v813_v5  ;;  %v187_v48 = vld [vmem:[%s1198_s3] sm:$0xff]  ;;  %v188_v62 = vld [vmem:[%s1198_s3 + $0x8] sm:$0xff] }
   0x4   :  { %v90_v6 = vsel %vm23_vm0, %v88_v2, 0.0  ;;  %v27_v7 = vsel %vm23_vm0, %v22_v3, 0.0  ;;  %191 = vperm.xlu2 %739, %v187_v48   ;;  %v199_v48 = vlaneseq }
   0x5   :  { %91 = vadd.xlane.f32.xlu1 %v90_v6  ;;  %28 = vadd.xlane.f32.xlu0 %v27_v7  ;;  %v93_v10 = vsel %vm23_vm0, %v89_v8, 0.0  ;;  %v24_v11 = vsel %vm23_vm0, %v21_v9, 0.0 }
   0xc   :  { %194 = vperm.xlu2 %739, %v188_v62  }
   0xd   :  { %94 = vadd.xlane.f32.xlu1 %v93_v10  ;;  %25 = vadd.xlane.f32.xlu0 %v24_v11 }
  0x78   :  { %v92_v12 = vpop.xlane.xlu1 %91  ;;  %v29_v13 = vpop.xlane.xlu0 %28 }
  0x79   :  { %742 = vrsqrt.f32 %v92_v12  ;;  %vm103_vm1 = vcmp.eq.f32.partialorder %v92_v12, inf  ;;  %vm105_vm2 = vcmp.eq.f32.partialorder %v92_v12, 0.0  ;;  %v106_v34 = vand.u32 2147483648, %v92_v12 }
  0x7a   :  { %744 = vrsqrt.f32 %v29_v13  ;;  %vm49_vm3 = vcmp.eq.f32.partialorder %v29_v13, inf  ;;  %v52_v38 = vand.u32 2147483648, %v29_v13  ;;  %vm51_vm4 = vcmp.eq.f32.partialorder %v29_v13, 0.0 }
  0x7f   :  { %v743_v14 = vpop.eup %742 }
  0x80   :  { %v745_v15 = vpop.eup %744  ;;  %v97_v16 = vmul.f32 %v743_v14, %v92_v12  ;;  %v95_v17 = vpop.xlane.xlu1 %94 }
  0x81   :  { %v26_v18 = vpop.xlane.xlu0 %25  ;;  %v43_v19 = vmul.f32 %v745_v15, %v29_v13  ;;  %746 = vrsqrt.f32 %v95_v17  ;;  %vm115_vm5 = vcmp.eq.f32.partialorder %v95_v17, inf  ;;  %v118_v53 = vand.u32 2147483648, %v95_v17 }
  0x82   :  { %v98_v20 = vmul.f32 %v743_v14, %v97_v16  ;;  %748 = vrsqrt.f32 %v26_v18  ;;  %vm117_vm6 = vcmp.eq.f32.partialorder %v95_v17, 0.0  ;;  %vm37_vm7 = vcmp.eq.f32.partialorder %v26_v18, inf }
  0x83   :  { %v44_v21 = vmul.f32 %v745_v15, %v43_v19  ;;  %v40_v56 = vand.u32 2147483648, %v26_v18  ;;  %vm39_vm8 = vcmp.eq.f32.partialorder %v26_v18, 0.0 }
  0x84   :  { %v99_v22 = vmul.f32 0.5, %v98_v20 }
  0x85   :  { %v45_v23 = vmul.f32 0.5, %v44_v21 }
  0x86   :  { %v100_v24 = vsub.f32 1.5, %v99_v22 }
  0x87   :  { %v747_v25 = vpop.eup %746  ;;  %v46_v26 = vsub.f32 1.5, %v45_v23 }
  0x88   :  { %v749_v27 = vpop.eup %748  ;;  %v101_v28 = vmul.f32 %v743_v14, %v100_v24  ;;  %v109_v29 = vmul.f32 %v747_v25, %v95_v17 }
  0x89   :  { %v47_v30 = vmul.f32 %v745_v15, %v46_v26  ;;  %v31_v31 = vmul.f32 %v749_v27, %v26_v18 }
  0x8a   :  { %v102_v32 = vmul.f32 %v101_v28, %v92_v12  ;;  %v110_v33 = vmul.f32 %v747_v25, %v109_v29 }
  0x8b   :  { %v48_v35 = vmul.f32 %v47_v30, %v29_v13  ;;  %v32_v36 = vmul.f32 %v749_v27, %v31_v31 }
  0x8c   :  { %v104_v37 = vsel %vm103_vm1, %v92_v12, %v102_v32  ;;  %v111_v39 = vmul.f32 0.5, %v110_v33 }
  0x8d   :  { %v107_v40 = vsel %vm105_vm2, %v106_v34, %v104_v37  ;;  %v50_v41 = vsel %vm49_vm3, %v29_v13, %v48_v35  ;;  %v33_v42 = vmul.f32 0.5, %v32_v36 }
  0x8e   :  { %v823_v43 = vmax.f32 %v107_v40, 1e-12  ;;  %v53_v44 = vsel %vm51_vm4, %v52_v38, %v50_v41  ;;  %v112_v45 = vsub.f32 1.5, %v111_v39 }
  0x8f   :  { %v34_v46 = vsub.f32 1.5, %v33_v42  ;;  %v55_v47 = vmax.f32 %v53_v44, 1e-12 }
  0x90   :  { %750 = vrcp.f32 %v823_v43  ;;  %v113_v49 = vmul.f32 %v747_v25, %v112_v45  ;;  %vm127_vm13 = vweird.f32 %v823_v43  ;;  %v133_v24 = vand.u32 2147483648, %v823_v43 }
  0x91   :  { %v35_v51 = vmul.f32 %v749_v27, %v34_v46  ;;  %752 = vrcp.f32 %v55_v47  ;;  %v82_v8 = vand.u32 2147483648, %v55_v47  ;;  %v80_v11 = vand.u32 2147483647, %v55_v47 }
  0x92   :  { %v114_v52 = vmul.f32 %v113_v49, %v95_v17  ;;  %vm76_vm10 = vweird.f32 %v55_v47  ;;  %v131_v31 = vand.u32 2147483647, %v823_v43  ;;  %v134_v39 = vor.u32 1.1754944e-38, %v133_v24 }
  0x93   :  { %v36_v54 = vmul.f32 %v35_v51, %v26_v18  ;;  %v83_v15 = vor.u32 1.1754944e-38, %v82_v8  ;;  %vm81_vm12 = vcmp.eq.f32.partialorder %v80_v11, 8.507059e+37  ;;  %v864_v49 = vand.u32 127, %v199_v48 }
  0x94   :  { %v116_v55 = vsel %vm115_vm5, %v95_v17, %v114_v52  ;;  %v203_v51 = vshrl.u32 %v199_v48, 7 }
  0x95   :  { %v119_v57 = vsel %vm117_vm6, %v118_v53, %v116_v55  ;;  %v38_v58 = vsel %vm37_vm7, %v26_v18, %v36_v54 }
  0x96   :  { %v829_v59 = vpop.eup %750  ;;  %v121_v60 = vmax.f32 %v119_v57, 1e-12  ;;  %v41_v61 = vsel %vm39_vm8, %v40_v56, %v38_v58  ;;  %vm132_vm8 = vcmp.eq.f32.partialorder %v131_v31, 8.507059e+37 }
  0x97   :  { %v753_v63 = vpop.eup %752  ;;  %v54_v2 = vmax.f32 %v41_v61, 1e-12  ;;  %v123_v3 = vmul.f32 %v829_v59, %v823_v43  ;;  %vm128_vm14 = vweird.f32 %v829_v59 }
  0x98   :  { %754 = vrcp.f32 %v121_v60  ;;  %v72_v6 = vmul.f32 %v753_v63, %v55_v47  ;;  %vm77_vm9 = vweird.f32 %v753_v63  ;;  %v148_v30 = vand.u32 2147483648, %v121_v60  ;;  %vm846_vm2 = vmor %vm127_vm13, %vm128_vm14  ;;  %v192_v47 = vpop.permute.xlu2 %191 }
  0x99   :  { %756 = vrcp.f32 %v54_v2  ;;  %v124_v9 = vsub.f32 1.0, %v123_v3  ;;  %vm78_vm11 = vmor %vm76_vm10, %vm77_vm9  ;;  %v67_v25 = vand.u32 2147483648, %v54_v2  ;;  %v65_v29 = vand.u32 2147483647, %v54_v2 }
  0x9a   :  { %v73_v7 = vsub.f32 1.0, %v72_v6  ;;  %vm142_vm3 = vweird.f32 %v121_v60  ;;  %v146_v33 = vand.u32 2147483647, %v121_v60  ;;  %vm61_vm4 = vweird.f32 %v54_v2 }
  0x9b   :  { %v125_v16 = vmul.f32 %v829_v59, %v124_v9  ;;  %v68_v35 = vor.u32 1.1754944e-38, %v67_v25  ;;  %vm66_vm7 = vcmp.eq.f32.partialorder %v65_v29, 8.507059e+37  ;;  %v149_v40 = vor.u32 1.1754944e-38, %v148_v30 }
  0x9c   :  { %v74_v10 = vmul.f32 %v753_v63, %v73_v7  ;;  %vm147_vm9 = vcmp.eq.f32.partialorder %v146_v33, 8.507059e+37  ;;  %vm759_vm13 = vmmov 1  }
  0x9d   :  { %v126_v26 = vadd.f32 %v829_v59, %v125_v16 }
  0x9e   :  { %v755_v12 = vpop.eup %754  ;;  %v75_v13 = vadd.f32 %v753_v63, %v74_v10 }
  0x9f   :  { %v757_v14 = vpop.eup %756  ;;  %v138_v17 = vmul.f32 %v755_v12, %v121_v60  ;;  %vm143_vm15 = vweird.f32 %v755_v12  ;;  %v130_v36 = vsel %vm846_vm2, %v829_v59, %v126_v26 }
  0xa0   :  { %v79_v18 = vsel %vm78_vm11, %v753_v63, %v75_v13  ;;  %v57_v19 = vmul.f32 %v757_v14, %v54_v2  ;;  %vm62_vm1 = vweird.f32 %v757_v14  ;;  %vm144_vm5 = vmor %vm142_vm3, %vm143_vm15  ;;  %v135_v43 = vsel %vm132_vm8, %v134_v39, %v130_v36  ;;  %v195_v50 = vpop.permute.xlu2 %194 }
  0xa1   :  { %v84_v20 = vsel %vm81_vm12, %v83_v15, %v79_v18  ;;  %v139_v21 = vsub.f32 1.0, %v138_v17  ;;  %vm63_vm6 = vmor %vm61_vm4, %vm62_vm1  ;;  %v136_v45 = vmul.f32 %v135_v43, %v794_v0  ;;  %vm213_vm11 = vcmp.ne.s32.totalorder %v864_v49, %v203_v51 }
  0xa2   :  { %v85_v22 = vmul.f32 %v84_v20, %v799_v1  ;;  %v58_v23 = vsub.f32 1.0, %v57_v19  ;;  %vm208_vm15 = vcmp.lt.s32.totalorder %v864_v49, 16  ;;  %v204_v0 = vadd.s32 8, %v203_v51 }
  0xa3   :  { %v140_v27 = vmul.f32 %v755_v12, %v139_v21  ;;  %vm225_vm3 = vcmask 130048  }
  0xa4   :  { %692 = vmatpush.xpose.msk.msra.mxu0 %vm23_vm0, %v85_v22  ;;  %730 = vmatpush.xpose.msk.msra.mxu1 %vm23_vm0, %v85_v22  ;;  %v59_v28 = vmul.f32 %v757_v14, %v58_v23 }
  0xa5   :  { %v141_v32 = vadd.f32 %v755_v12, %v140_v27 }
  0xa6   :  { %v60_v34 = vadd.f32 %v757_v14, %v59_v28 }
  0xa7   :  { %v145_v37 = vsel %vm144_vm5, %v755_v12, %v141_v32 }
  0xa8   :  { %v64_v38 = vsel %vm63_vm6, %v757_v14, %v60_v34  ;;  %v150_v44 = vsel %vm147_vm9, %v149_v40, %v145_v37  ;;  %vm214_vm6 = vcmp.ne.s32.totalorder %v864_v49, %v204_v0 }
  0xa9   :  { %v69_v41 = vsel %vm66_vm7, %v68_v35, %v64_v38  ;;  %v151_v46 = vmul.f32 %v150_v44, %v808_v4 }
  0xaa   :  { %v70_v42 = vmul.f32 %v69_v41, %v813_v5  ;;  %v741_v5 = vld [vmem:[%s1197_s2] ss:$0 sm:$0xff] }
  0xab   :  { %vm198_vm10 = vcmp.eq.s32.totalorder %v195_v50, %v741_v5  ;;  %vm197_vm12 = vcmp.eq.s32.totalorder %v192_v47, %v741_v5 }
  0xac   :  { %693 = vmatpush.xpose.msk.msra.mxu0 %vm23_vm0, %v70_v42  ;;  %731 = vmatpush.xpose.msk.msra.mxu1 %vm23_vm0, %v70_v42  ;;  %vm220_vm14 = vmxor %vm198_vm10, %vm759_vm13 }
  0xad   :  { %vm219_vm1 = vmxor %vm197_vm12, %vm759_vm13 }
  0xae   :  { %vm871_vm2 = vmand %vm220_vm14, %vm208_vm15 }
  0xaf   :  { %694 = vmatmul.msk.f32.vlgmr.msra.gmra.mxu0 %vm23_vm0, %v136_v45  ;;  %695 = vmatmul.msk.f32.vlgmr.msra.gmra.mxu1 %vm23_vm0, %v151_v46  ;;  %vm215_vm0 = vmand %vm197_vm12, %vm213_vm11  ;;  %vm356_vm11 = vcmp.eq.s32.totalorder %v864_v49, 4 }
  0xb0   :  { %vm877_vm4 = vmand %vm215_vm0, %vm208_vm15  ;;  %vm406_vm0 = vcmp.eq.s32.totalorder %v864_v49, 6 }
  0xb1   :  { %vm887_vm5 = vmand %vm219_vm1, %vm208_vm15  ;;  %vm306_vm1 = vcmp.eq.s32.totalorder %v864_v49, 2 }
  0xb2   :  { %vm216_vm7 = vmand %vm198_vm10, %vm214_vm6  ;;  %vm256_vm10 = vcmp.eq.s32.totalorder %v864_v49, 0  ;;  %vm331_vm6 = vcmp.eq.s32.totalorder %v864_v49, 3 }
  0xb3   :  { %vm218_vm8 = vmand %vm216_vm7, %vm208_vm15  ;;  %vm281_vm15 = vcmp.eq.s32.totalorder %v864_v49, 1  ;;  %vm481_vm7 = vcmp.eq.s32.totalorder %v864_v49, 9 }
 0x12c   :  { %v881_v53 = vpop.f32.mrf.mxu0  ;;  %v883_v54 = vpop.f32.mrf.mxu1 }
 0x12d   :  { %v224_v56 = vsel %vm871_vm2, %v883_v54, -inf  ;;  %v232_v57 = vsel %vm877_vm4, %v881_v53, inf  ;;  %v223_v58 = vsel %vm887_vm5, %v881_v53, -inf  ;;  %v233_v62 = vsel %vm218_vm8, %v883_v54, inf }
 0x12e   :  { %v229_v59 = vsel %vm225_vm3, %v224_v56, -inf  ;;  %v234_v60 = vsel %vm225_vm3, %v232_v57, inf  ;;  %v226_v61 = vsel %vm225_vm3, %v223_v58, -inf  ;;  %v237_v63 = vsel %vm225_vm3, %v233_v62, inf }
 0x12f   :  { %230 = vmax.xlane.f32.xlu1 %v229_v59  ;;  %235 = vmin.xlane.f32.xlu2 %v234_v60  ;;  %v697_v2 = vadd.f32 -0.1, %v883_v54  ;;  %v696_v6 = vadd.f32 -0.1, %v881_v53 }
 0x130   :  { %227 = vmax.xlane.f32.xlu0 %v226_v61 }
 0x138   :  { %238 = vmin.xlane.f32.xlu0 %v237_v63 }
 0x1a2   :  { %v231_v3 = vpop.xlane.xlu1 %230 }
 0x1a3   :  { %vm243_vm9 = vcmp.lt.f32.partialorder %v697_v2, %v231_v3  ;;  %v228_v7 = vpop.xlane.xlu0 %227 }
 0x1a4   :  { %vm245_vm12 = vmand %vm218_vm8, %vm243_vm9  ;;  %vm242_vm13 = vcmp.lt.f32.partialorder %v696_v6, %v228_v7  ;;  %vm506_vm8 = vcmp.eq.s32.totalorder %v864_v49, 10  ;;  %vm381_vm9 = vcmp.eq.s32.totalorder %v864_v49, 5 }
 0x1a5   :  { %v914_v8 = vsel %vm245_vm12, %v883_v54, inf  ;;  %vm244_vm14 = vmand %vm877_vm4, %vm242_vm13  ;;  %vm431_vm4 = vcmp.eq.s32.totalorder %v864_v49, 7  ;;  %vm456_vm12 = vcmp.eq.s32.totalorder %v864_v49, 8  ;;  %vm631_vm13 = vcmp.eq.s32.totalorder %v864_v49, 15 }
 0x1a6   :  { %v358_v9 = vsel %vm356_vm11, %v914_v8, -inf  ;;  %v258_v10 = vsel %vm256_vm10, %v914_v8, -inf  ;;  %v923_v11 = vsel %vm244_vm14, %v881_v53, inf  ;;  %v283_v16 = vsel %vm281_vm15, %v914_v8, -inf }
 0x1a7   :  { %v362_v12 = vsel %vm225_vm3, %v358_v9, -inf  ;;  %v262_v13 = vsel %vm225_vm3, %v258_v10, -inf  ;;  %v257_v14 = vsel %vm256_vm10, %v923_v11, -inf  ;;  %v407_v17 = vsel %vm406_vm0, %v923_v11, -inf }
 0x1a8   :  { %363 = vmax.xlane.f32.xlu2 %v362_v12  ;;  %263 = vmax.xlane.f32.xlu0 %v262_v13  ;;  %v259_v15 = vsel %vm225_vm3, %v257_v14, -inf  ;;  %v282_v18 = vsel %vm281_vm15, %v923_v11, -inf  ;;  %v287_v19 = vsel %vm225_vm3, %v283_v16, -inf  ;;  %v409_v20 = vsel %vm225_vm3, %v407_v17, -inf }
 0x1a9   :  { %260 = vmax.xlane.f32.xlu1 %v259_v15  ;;  %v284_v21 = vsel %vm225_vm3, %v282_v18, -inf  ;;  %v308_v22 = vsel %vm306_vm1, %v914_v8, -inf  ;;  %v433_v23 = vsel %vm431_vm4, %v914_v8, -inf  ;;  %v307_v24 = vsel %vm306_vm1, %v923_v11, -inf }
 0x1aa   :  { %v312_v25 = vsel %vm225_vm3, %v308_v22, -inf  ;;  %v437_v26 = vsel %vm225_vm3, %v433_v23, -inf  ;;  %v309_v27 = vsel %vm225_vm3, %v307_v24, -inf  ;;  %v333_v28 = vsel %vm331_vm6, %v914_v8, -inf }
 0x1ab   :  { %v482_v29 = vsel %vm481_vm7, %v923_v11, -inf  ;;  %v332_v30 = vsel %vm331_vm6, %v923_v11, -inf  ;;  %v337_v1 = vsel %vm225_vm3, %v333_v28, -inf  ;;  %v508_v33 = vsel %vm506_vm8, %v914_v8, -inf  ;;  %v239_v17 = vpop.xlane.xlu0 %238 }
 0x1ac   :  { %v484_v31 = vsel %vm225_vm3, %v482_v29, -inf  ;;  %v334_v32 = vsel %vm225_vm3, %v332_v30, -inf  ;;  %v382_v34 = vsel %vm381_vm9, %v923_v11, -inf  ;;  %v357_v35 = vsel %vm356_vm11, %v923_v11, -inf }
 0x1ad   :  { %v512_v36 = vsel %vm225_vm3, %v508_v33, -inf  ;;  %v384_v37 = vsel %vm225_vm3, %v382_v34, -inf  ;;  %v359_v38 = vsel %vm225_vm3, %v357_v35, -inf  ;;  %vm556_vm10 = vcmp.eq.s32.totalorder %v864_v49, 12 }
 0x1ae   :  { %v557_v39 = vsel %vm556_vm10, %v923_v11, -inf  ;;  %v408_v40 = vsel %vm406_vm0, %v914_v8, -inf  ;;  %v383_v41 = vsel %vm381_vm9, %v914_v8, -inf  ;;  %vm581_vm11 = vcmp.eq.s32.totalorder %v864_v49, 13 }
 0x1af   :  { %v559_v42 = vsel %vm225_vm3, %v557_v39, -inf  ;;  %v412_v43 = vsel %vm225_vm3, %v408_v40, -inf  ;;  %v387_v44 = vsel %vm225_vm3, %v383_v41, -inf  ;;  %v583_v45 = vsel %vm581_vm11, %v914_v8, -inf }
 0x1b0   :  { %288 = vmax.xlane.f32.xlu0 %v287_v19  ;;  %410 = vmax.xlane.f32.xlu2 %v409_v20  ;;  %v457_v46 = vsel %vm456_vm12, %v923_v11, -inf  ;;  %v432_v47 = vsel %vm431_vm4, %v923_v11, -inf  ;;  %v587_v48 = vsel %vm225_vm3, %v583_v45, -inf  ;;  %v632_v51 = vsel %vm631_vm13, %v923_v11, -inf  ;;  %v236_v19 = vpop.xlane.xlu2 %235 }
 0x1b1   :  { %285 = vmax.xlane.f32.xlu1 %v284_v21  ;;  %v459_v5 = vsel %vm225_vm3, %v457_v46, -inf  ;;  %v434_v50 = vsel %vm225_vm3, %v432_v47, -inf  ;;  %v483_v0 = vsel %vm481_vm7, %v914_v8, -inf  ;;  %v458_v52 = vsel %vm456_vm12, %v914_v8, -inf }
 0x1b2   :  { %v634_v56 = vsel %vm225_vm3, %v632_v51, -inf  ;;  %v487_v57 = vsel %vm225_vm3, %v483_v0, -inf  ;;  %v462_v58 = vsel %vm225_vm3, %v458_v52, -inf  ;;  %vm531_vm14 = vcmp.eq.s32.totalorder %v864_v49, 11 }
 0x1b3   :  { %v532_v59 = vsel %vm531_vm14, %v923_v11, -inf  ;;  %v507_v60 = vsel %vm506_vm8, %v923_v11, -inf  ;;  %v558_v63 = vsel %vm556_vm10, %v914_v8, -inf  ;;  %v533_v2 = vsel %vm531_vm14, %v914_v8, -inf }
 0x1b4   :  { %v534_v61 = vsel %vm225_vm3, %v532_v59, -inf  ;;  %v509_v62 = vsel %vm225_vm3, %v507_v60, -inf  ;;  %v562_v3 = vsel %vm225_vm3, %v558_v63, -inf  ;;  %v537_v6 = vsel %vm225_vm3, %v533_v2, -inf }
 0x1b5   :  { %vm606_vm15 = vcmp.eq.s32.totalorder %v864_v49, 14  ;;  %v582_v9 = vsel %vm581_vm11, %v923_v11, -inf  ;;  %v633_v13 = vsel %vm631_vm13, %v914_v8, -inf }
 0x1b6   :  { %v607_v7 = vsel %vm606_vm15, %v923_v11, -inf  ;;  %v584_v12 = vsel %vm225_vm3, %v582_v9, -inf  ;;  %v608_v14 = vsel %vm606_vm15, %v914_v8, -inf  ;;  %v637_v15 = vsel %vm225_vm3, %v633_v13, -inf }
 0x1b7   :  { %v609_v10 = vsel %vm225_vm3, %v607_v7, -inf  ;;  %v612_v16 = vsel %vm225_vm3, %v608_v14, -inf  ;;  %v246_v8 = vadd.f32 0.1, %v881_v53 }
 0x1b8   :  { %313 = vmax.xlane.f32.xlu0 %v312_v25  ;;  %438 = vmax.xlane.f32.xlu2 %v437_v26 }
 0x1b9   :  { %310 = vmax.xlane.f32.xlu1 %v309_v27  ;;  %v247_v27 = vadd.f32 0.1, %v883_v54  ;;  %vm248_vm0 = vcmp.gt.f32.partialorder %v246_v8, %v236_v19 }
 0x1ba   :  { %vm250_vm4 = vmand %vm887_vm5, %vm248_vm0 }
 0x1bb   :  { %vm249_vm1 = vcmp.gt.f32.partialorder %v247_v27, %v239_v17 }
 0x1bc   :  { %vm251_vm6 = vmand %vm871_vm2, %vm249_vm1 }
 0x1c0   :  { %338 = vmax.xlane.f32.xlu0 %v337_v1  ;;  %485 = vmax.xlane.f32.xlu2 %v484_v31  ;;  %v1040_v1 = vsel %vm250_vm4, %v881_v53, -inf  ;;  %v1043_v31 = vsel %vm251_vm6, %v883_v54, -inf }
 0x1c1   :  { %335 = vmax.xlane.f32.xlu1 %v334_v32 }
 0x1c8   :  { %513 = vmax.xlane.f32.xlu2 %v512_v36  ;;  %385 = vmax.xlane.f32.xlu0 %v384_v37 }
 0x1c9   :  { %360 = vmax.xlane.f32.xlu1 %v359_v38 }
 0x1d0   :  { %560 = vmax.xlane.f32.xlu2 %v559_v42  ;;  %413 = vmax.xlane.f32.xlu0 %v412_v43 }
 0x1d1   :  { %388 = vmax.xlane.f32.xlu1 %v387_v44 }
 0x1d8   :  { %588 = vmax.xlane.f32.xlu2 %v587_v48  ;;  %460 = vmax.xlane.f32.xlu0 %v459_v5 }
 0x1d9   :  { %435 = vmax.xlane.f32.xlu1 %v434_v50 }
 0x1e0   :  { %635 = vmax.xlane.f32.xlu2 %v634_v56  ;;  %488 = vmax.xlane.f32.xlu0 %v487_v57 }
 0x1e1   :  { %463 = vmax.xlane.f32.xlu1 %v462_v58  ;;  %v760_v58 = vmov 0.0  }
 0x1e8   :  { %535 = vmax.xlane.f32.xlu0 %v534_v61 }
 0x1e9   :  { %510 = vmax.xlane.f32.xlu1 %v509_v62 }
 0x1f0   :  { %563 = vmax.xlane.f32.xlu0 %v562_v3 }
 0x1f1   :  { %538 = vmax.xlane.f32.xlu1 %v537_v6 }
 0x1f8   :  { %610 = vmax.xlane.f32.xlu0 %v609_v10 }
 0x1f9   :  { %585 = vmax.xlane.f32.xlu1 %v584_v12 }
 0x200   :  { %638 = vmax.xlane.f32.xlu0 %v637_v15 }
 0x201   :  { %613 = vmax.xlane.f32.xlu1 %v612_v16 }
 0x21b   :  { %v264_v11 = vpop.xlane.xlu0 %263  ;;  %v364_v22 = vpop.xlane.xlu2 %363 }
 0x21c   :  { %v261_v18 = vpop.xlane.xlu1 %260  ;;  %v266_v32 = vsub.f32 %v1043_v31, %v264_v11  ;;  %v366_v54 = vsub.f32 %v1043_v31, %v364_v22 }
 0x21d   :  { %v265_v34 = vsub.f32 %v1040_v1, %v261_v18 }
 0x21e   :  { %v268_v4 = vadd.f32 0.2, %v266_v32  ;;  %v1059_v47 = vadd.f32 0.2, %v366_v54 }
 0x21f   :  { %v267_v39 = vadd.f32 0.2, %v265_v34 }
 0x220   :  { %vm270_vm2 = vcmp.gt.f32.partialorder %v268_v4, 0.0  ;;  %vm370_vm11 = vcmp.gt.f32.partialorder %v1059_v47, 0.0 }
 0x221   :  { %vm269_vm7 = vcmp.gt.f32.partialorder %v267_v39, 0.0  ;;  %v272_v50 = vsel %vm270_vm2, %v268_v4, 0.0  ;;  %v699_v59 = vsel %vm270_vm2, 1.0, %v760_v58 }
 0x222   :  { %v271_v57 = vsel %vm269_vm7, %v267_v39, 0.0  ;;  %v698_v6 = vsel %vm269_vm7, 1.0, %v760_v58 }
 0x223   :  { %v289_v20 = vpop.xlane.xlu0 %288  ;;  %v411_v25 = vpop.xlane.xlu2 %410 }
 0x224   :  { %v286_v21 = vpop.xlane.xlu1 %285  ;;  %v291_v55 = vsub.f32 %v1043_v31, %v289_v20  ;;  %v415_v44 = vsub.f32 %v1040_v1, %v411_v25 }
 0x225   :  { %v290_v33 = vsub.f32 %v1040_v1, %v286_v21 }
 0x226   :  { %v293_v41 = vadd.f32 0.2, %v291_v55  ;;  %v1063_v51 = vadd.f32 0.2, %v415_v44 }
 0x227   :  { %v292_v37 = vadd.f32 0.2, %v290_v33 }
 0x228   :  { %vm295_vm8 = vcmp.gt.f32.partialorder %v293_v41, 0.0  ;;  %vm419_vm13 = vcmp.gt.f32.partialorder %v1063_v51, 0.0 }
 0x229   :  { %vm294_vm5 = vcmp.gt.f32.partialorder %v292_v37, 0.0  ;;  %v297_v62 = vsel %vm295_vm8, %v293_v41, 0.0  ;;  %v701_v9 = vsel %vm295_vm8, 1.0, %v760_v58 }
 0x22a   :  { %v296_v0 = vsel %vm294_vm5, %v292_v37, 0.0  ;;  %v700_v61 = vsel %vm294_vm5, 1.0, %v760_v58  ;;  %v299_v16 = vadd.f32 %v297_v62, %v272_v50  ;;  %v305_v25 = vadd.f32 %v701_v9, %v699_v59 }
 0x22b   :  { %v314_v23 = vpop.xlane.xlu0 %313  ;;  %v1033_v28 = vpop.xlane.xlu2 %438  ;;  %v298_v7 = vadd.f32 %v296_v0, %v271_v57  ;;  %v304_v15 = vadd.f32 %v700_v61, %v698_v6 }
 0x22c   :  { %v311_v24 = vpop.xlane.xlu1 %310  ;;  %v316_v45 = vsub.f32 %v1043_v31, %v314_v23  ;;  %v441_v21 = vsub.f32 %v1043_v31, %v1033_v28 }
 0x22d   :  { %v315_v35 = vsub.f32 %v1040_v1, %v311_v24 }
 0x22e   :  { %v318_v52 = vadd.f32 0.2, %v316_v45  ;;  %v443_v4 = vadd.f32 0.2, %v441_v21 }
 0x22f   :  { %v317_v42 = vadd.f32 0.2, %v315_v35 }
 0x230   :  { %vm320_vm14 = vcmp.gt.f32.partialorder %v318_v52, 0.0  ;;  %vm445_vm6 = vcmp.gt.f32.partialorder %v443_v4, 0.0 }
 0x231   :  { %vm319_vm9 = vcmp.gt.f32.partialorder %v317_v42, 0.0  ;;  %v322_v23 = vsel %vm320_vm14, %v318_v52, 0.0  ;;  %v447_v9 = vsel %vm445_vm6, %v443_v4, 0.0 }
 0x232   :  { %v321_v63 = vsel %vm319_vm9, %v317_v42, 0.0  ;;  %v702_v12 = vsel %vm319_vm9, 1.0, %v760_v58  ;;  %v324_v28 = vadd.f32 %v322_v23, %v299_v16  ;;  %v372_v42 = vsel %vm370_vm11, %v1059_v47, 0.0 }
 0x233   :  { %v339_v49 = vpop.xlane.xlu0 %338  ;;  %v1052_v38 = vpop.xlane.xlu2 %485  ;;  %v323_v17 = vadd.f32 %v321_v63, %v298_v7  ;;  %v329_v22 = vadd.f32 %v702_v12, %v304_v15 }
 0x234   :  { %v336_v26 = vpop.xlane.xlu1 %335  ;;  %v341_v48 = vsub.f32 %v1043_v31, %v339_v49  ;;  %v703_v49 = vsel %vm320_vm14, 1.0, %v760_v58 }
 0x235   :  { %v340_v53 = vsub.f32 %v1040_v1, %v336_v26  ;;  %v330_v37 = vadd.f32 %v703_v49, %v305_v25 }
 0x236   :  { %v343_v2 = vadd.f32 0.2, %v341_v48 }
 0x237   :  { %v342_v46 = vadd.f32 0.2, %v340_v53  ;;  %v490_v53 = vsub.f32 %v1040_v1, %v1052_v38 }
 0x238   :  { %vm345_vm15 = vcmp.gt.f32.partialorder %v343_v2, 0.0 }
 0x239   :  { %vm344_vm10 = vcmp.gt.f32.partialorder %v342_v46, 0.0  ;;  %v705_v33 = vsel %vm345_vm15, 1.0, %v760_v58  ;;  %v492_v47 = vadd.f32 0.2, %v490_v53 }
 0x23a   :  { %v346_v13 = vsel %vm344_vm10, %v342_v46, 0.0  ;;  %v704_v18 = vsel %vm344_vm10, 1.0, %v760_v58 }
 0x23b   :  { %v386_v29 = vpop.xlane.xlu0 %385  ;;  %v1081_v10 = vpop.xlane.xlu2 %513  ;;  %v348_v24 = vadd.f32 %v346_v13, %v323_v17  ;;  %vm494_vm5 = vcmp.gt.f32.partialorder %v492_v47, 0.0 }
 0x23c   :  { %v361_v30 = vpop.xlane.xlu1 %360  ;;  %v390_v60 = vsub.f32 %v1040_v1, %v386_v29  ;;  %v354_v29 = vadd.f32 %v704_v18, %v329_v22  ;;  %v516_v16 = vsub.f32 %v1043_v31, %v1081_v10  ;;  %v713_v22 = vsel %vm445_vm6, 1.0, %v760_v58 }
 0x23d   :  { %v365_v43 = vsub.f32 %v1040_v1, %v361_v30  ;;  %v347_v30 = vsel %vm345_vm15, %v343_v2, 0.0 }
 0x23e   :  { %v392_v11 = vadd.f32 0.2, %v390_v60  ;;  %v349_v39 = vadd.f32 %v347_v30, %v324_v28  ;;  %v710_v60 = vsel %vm419_vm13, 1.0, %v760_v58  ;;  %v716_v30 = vsel %vm494_vm5, 1.0, %v760_v58 }
 0x23f   :  { %v367_v5 = vadd.f32 0.2, %v365_v43  ;;  %v355_v43 = vadd.f32 %v705_v33, %v330_v37  ;;  %v518_v33 = vadd.f32 0.2, %v516_v16 }
 0x240   :  { %vm394_vm0 = vcmp.gt.f32.partialorder %v392_v11, 0.0  ;;  %v374_v52 = vadd.f32 %v372_v42, %v349_v39 }
 0x241   :  { %vm369_vm12 = vcmp.gt.f32.partialorder %v367_v5, 0.0  ;;  %v708_v38 = vsel %vm394_vm0, 1.0, %v760_v58 }
 0x242   :  { %v371_v19 = vsel %vm369_vm12, %v367_v5, 0.0  ;;  %v706_v26 = vsel %vm369_vm12, 1.0, %v760_v58  ;;  %v421_v5 = vsel %vm419_vm13, %v1063_v51, 0.0  ;;  %vm520_vm12 = vcmp.gt.f32.partialorder %v518_v33, 0.0 }
 0x243   :  { %v1050_v36 = vpop.xlane.xlu0 %413  ;;  %v373_v32 = vadd.f32 %v371_v19, %v348_v24  ;;  %v379_v54 = vadd.f32 %v706_v26, %v354_v29  ;;  %v561_v45 = vpop.xlane.xlu2 %560  ;;  %v496_v29 = vsel %vm494_vm5, %v492_v47, 0.0 }
 0x244   :  { %v389_v40 = vpop.xlane.xlu1 %388  ;;  %v416_v34 = vsub.f32 %v1043_v31, %v1050_v36  ;;  %v707_v36 = vsel %vm370_vm11, 1.0, %v760_v58  ;;  %v565_v23 = vsub.f32 %v1040_v1, %v561_v45 }
 0x245   :  { %v391_v14 = vsub.f32 %v1043_v31, %v389_v40  ;;  %v396_v40 = vsel %vm394_vm0, %v392_v11, 0.0  ;;  %v404_v50 = vadd.f32 %v708_v38, %v379_v54  ;;  %v380_v61 = vadd.f32 %v707_v36, %v355_v43 }
 0x246   :  { %v398_v44 = vadd.f32 %v396_v40, %v373_v32  ;;  %v418_v46 = vadd.f32 0.2, %v416_v34  ;;  %v567_v37 = vadd.f32 0.2, %v565_v23 }
 0x247   :  { %v393_v8 = vadd.f32 0.2, %v391_v14  ;;  %v429_v13 = vadd.f32 %v710_v60, %v404_v50 }
 0x248   :  { %v423_v62 = vadd.f32 %v421_v5, %v398_v44  ;;  %vm420_vm2 = vcmp.gt.f32.partialorder %v418_v46, 0.0  ;;  %vm569_vm13 = vcmp.gt.f32.partialorder %v567_v37, 0.0 }
 0x249   :  { %vm395_vm1 = vcmp.gt.f32.partialorder %v393_v8, 0.0  ;;  %v422_v17 = vsel %vm420_vm2, %v418_v46, 0.0 }
 0x24a   :  { %v397_v0 = vsel %vm395_vm1, %v393_v8, 0.0 }
 0x24b   :  { %v1066_v56 = vpop.xlane.xlu0 %460  ;;  %v399_v2 = vadd.f32 %v397_v0, %v374_v52  ;;  %v589_v25 = vpop.xlane.xlu2 %588 }
 0x24c   :  { %v436_v3 = vpop.xlane.xlu1 %435  ;;  %v465_v41 = vsub.f32 %v1040_v1, %v1066_v56  ;;  %v709_v56 = vsel %vm395_vm1, 1.0, %v760_v58 }
 0x24d   :  { %v440_v20 = vsub.f32 %v1040_v1, %v436_v3  ;;  %v405_v12 = vadd.f32 %v709_v56, %v380_v61  ;;  %v424_v19 = vadd.f32 %v422_v17, %v399_v2  ;;  %v522_v2 = vsel %vm520_vm12, %v518_v33, 0.0 }
 0x24e   :  { %v467_v57 = vadd.f32 0.2, %v465_v41 }
 0x24f   :  { %v442_v55 = vadd.f32 0.2, %v440_v20  ;;  %v711_v20 = vsel %vm420_vm2, 1.0, %v760_v58  ;;  %v449_v34 = vadd.f32 %v447_v9, %v424_v19  ;;  %v571_v9 = vsel %vm569_vm13, %v567_v37, 0.0 }
 0x250   :  { %vm469_vm7 = vcmp.gt.f32.partialorder %v467_v57, 0.0  ;;  %v430_v24 = vadd.f32 %v711_v20, %v405_v12 }
 0x251   :  { %vm444_vm4 = vcmp.gt.f32.partialorder %v442_v55, 0.0  ;;  %v471_v10 = vsel %vm469_vm7, %v467_v57, 0.0  ;;  %v714_v26 = vsel %vm469_vm7, 1.0, %v760_v58 }
 0x252   :  { %v446_v63 = vsel %vm444_vm4, %v442_v55, 0.0  ;;  %v712_v3 = vsel %vm444_vm4, 1.0, %v760_v58  ;;  %v455_v53 = vadd.f32 %v713_v22, %v430_v24 }
 0x253   :  { %v1099_v27 = vpop.xlane.xlu0 %488  ;;  %v448_v51 = vadd.f32 %v446_v63, %v423_v62  ;;  %v454_v11 = vadd.f32 %v712_v3, %v429_v13  ;;  %v636_v47 = vpop.xlane.xlu2 %635  ;;  %v719_v3 = vsel %vm520_vm12, 1.0, %v760_v58 }
 0x254   :  { %v464_v35 = vpop.xlane.xlu1 %463  ;;  %v491_v15 = vsub.f32 %v1043_v31, %v1099_v27  ;;  %v640_v12 = vsub.f32 %v1040_v1, %v636_v47 }
 0x255   :  { %v466_v48 = vsub.f32 %v1043_v31, %v464_v35  ;;  %v473_v49 = vadd.f32 %v471_v10, %v448_v51  ;;  %v479_v32 = vadd.f32 %v714_v26, %v454_v11  ;;  %v722_v11 = vsel %vm569_vm13, 1.0, %v760_v58 }
 0x256   :  { %v493_v8 = vadd.f32 0.2, %v491_v15  ;;  %v642_v23 = vadd.f32 0.2, %v640_v12 }
 0x257   :  { %v468_v6 = vadd.f32 0.2, %v466_v48  ;;  %v498_v41 = vadd.f32 %v496_v29, %v473_v49  ;;  %v504_v43 = vadd.f32 %v716_v30, %v479_v32 }
 0x258   :  { %vm495_vm10 = vcmp.gt.f32.partialorder %v493_v8, 0.0  ;;  %vm644_vm6 = vcmp.gt.f32.partialorder %v642_v23, 0.0 }
 0x259   :  { %vm470_vm8 = vcmp.gt.f32.partialorder %v468_v6, 0.0  ;;  %v497_v46 = vsel %vm495_vm10, %v493_v8, 0.0  ;;  %v717_v50 = vsel %vm495_vm10, 1.0, %v760_v58 }
 0x25a   :  { %v472_v28 = vsel %vm470_vm8, %v468_v6, 0.0  ;;  %v715_v55 = vsel %vm470_vm8, 1.0, %v760_v58 }
 0x25b   :  { %v536_v59 = vpop.xlane.xlu0 %535  ;;  %v474_v40 = vadd.f32 %v472_v28, %v449_v34  ;;  %v480_v36 = vadd.f32 %v715_v55, %v455_v53 }
 0x25c   :  { %v511_v7 = vpop.xlane.xlu1 %510  ;;  %v540_v21 = vsub.f32 %v1040_v1, %v536_v59  ;;  %v591_v59 = vsub.f32 %v1043_v31, %v589_v25 }
 0x25d   :  { %v515_v14 = vsub.f32 %v1040_v1, %v511_v7  ;;  %v499_v5 = vadd.f32 %v497_v46, %v474_v40  ;;  %v505_v52 = vadd.f32 %v717_v50, %v480_v36 }
 0x25e   :  { %v542_v35 = vadd.f32 0.2, %v540_v21 }
 0x25f   :  { %v517_v18 = vadd.f32 0.2, %v515_v14  ;;  %v524_v51 = vadd.f32 %v522_v2, %v499_v5  ;;  %v530_v15 = vadd.f32 %v719_v3, %v505_v52 }
 0x260   :  { %vm544_vm11 = vcmp.gt.f32.partialorder %v542_v35, 0.0 }
 0x261   :  { %vm519_vm9 = vcmp.gt.f32.partialorder %v517_v18, 0.0  ;;  %v546_v56 = vsel %vm544_vm11, %v542_v35, 0.0  ;;  %v720_v61 = vsel %vm544_vm11, 1.0, %v760_v58 }
 0x262   :  { %v521_v54 = vsel %vm519_vm9, %v517_v18, 0.0  ;;  %v718_v42 = vsel %vm519_vm9, 1.0, %v760_v58  ;;  %v593_v18 = vadd.f32 0.2, %v591_v59 }
 0x263   :  { %v564_v27 = vpop.xlane.xlu0 %563  ;;  %v523_v45 = vadd.f32 %v521_v54, %v498_v41  ;;  %v529_v48 = vadd.f32 %v718_v42, %v504_v43  ;;  %v646_v41 = vsel %vm644_vm6, %v642_v23, 0.0  ;;  %v728_v42 = vsel %vm644_vm6, 1.0, %v760_v58 }
 0x264   :  { %v539_v4 = vpop.xlane.xlu1 %538  ;;  %v566_v38 = vsub.f32 %v1043_v31, %v564_v27  ;;  %vm595_vm4 = vcmp.gt.f32.partialorder %v593_v18, 0.0 }
 0x265   :  { %v541_v39 = vsub.f32 %v1043_v31, %v539_v4  ;;  %v548_v60 = vadd.f32 %v546_v56, %v523_v45  ;;  %v554_v6 = vadd.f32 %v720_v61, %v529_v48  ;;  %v597_v53 = vsel %vm595_vm4, %v593_v18, 0.0 }
 0x266   :  { %v568_v62 = vadd.f32 0.2, %v566_v38  ;;  %v725_v54 = vsel %vm595_vm4, 1.0, %v760_v58 }
 0x267   :  { %v543_v44 = vadd.f32 0.2, %v541_v39  ;;  %v573_v19 = vadd.f32 %v571_v9, %v548_v60  ;;  %v579_v22 = vadd.f32 %v722_v11, %v554_v6 }
 0x268   :  { %vm570_vm15 = vcmp.gt.f32.partialorder %v568_v62, 0.0 }
 0x269   :  { %vm545_vm14 = vcmp.gt.f32.partialorder %v543_v44, 0.0  ;;  %v572_v8 = vsel %vm570_vm15, %v568_v62, 0.0  ;;  %v723_v27 = vsel %vm570_vm15, 1.0, %v760_v58 }
 0x26a   :  { %v547_v13 = vsel %vm545_vm14, %v543_v44, 0.0  ;;  %v721_v14 = vsel %vm545_vm14, 1.0, %v760_v58 }
 0x26b   :  { %v611_v0 = vpop.xlane.xlu0 %610  ;;  %v549_v20 = vadd.f32 %v547_v13, %v524_v51  ;;  %v555_v21 = vadd.f32 %v721_v14, %v530_v15 }
 0x26c   :  { %v615_v57 = vsub.f32 %v1040_v1, %v611_v0  ;;  %v586_v63 = vpop.xlane.xlu1 %585 }
 0x26d   :  { %v590_v7 = vsub.f32 %v1040_v1, %v586_v63  ;;  %v574_v30 = vadd.f32 %v572_v8, %v549_v20  ;;  %v580_v32 = vadd.f32 %v723_v27, %v555_v21 }
 0x26e   :  { %v617_v17 = vadd.f32 0.2, %v615_v57 }
 0x26f   :  { %v592_v16 = vadd.f32 0.2, %v590_v7  ;;  %v599_v39 = vadd.f32 %v597_v53, %v574_v30  ;;  %v605_v40 = vadd.f32 %v725_v54, %v580_v32 }
 0x270   :  { %vm619_vm1 = vcmp.gt.f32.partialorder %v617_v17, 0.0 }
 0x271   :  { %vm594_vm0 = vcmp.gt.f32.partialorder %v592_v16, 0.0  ;;  %v621_v34 = vsel %vm619_vm1, %v617_v17, 0.0  ;;  %v726_v55 = vsel %vm619_vm1, 1.0, %v760_v58 }
 0x272   :  { %v596_v24 = vsel %vm594_vm0, %v592_v16, 0.0  ;;  %v724_v1 = vsel %vm594_vm0, 1.0, %v760_v58 }
 0x273   :  { %v639_v25 = vpop.xlane.xlu0 %638  ;;  %v598_v10 = vadd.f32 %v596_v24, %v573_v19  ;;  %v604_v49 = vadd.f32 %v724_v1, %v579_v22 }
 0x274   :  { %v641_v26 = vsub.f32 %v1043_v31, %v639_v25  ;;  %v614_v29 = vpop.xlane.xlu1 %613 }
 0x275   :  { %v616_v28 = vsub.f32 %v1043_v31, %v614_v29  ;;  %v623_v35 = vadd.f32 %v621_v34, %v598_v10  ;;  %v629_v4 = vadd.f32 %v726_v55, %v604_v49 }
 0x276   :  { %v643_v33 = vadd.f32 0.2, %v641_v26 }
 0x277   :  { %v618_v37 = vadd.f32 0.2, %v616_v28  ;;  %v654_v45 = vadd.f32 %v728_v42, %v629_v4  ;;  %v648_v38 = vadd.f32 %v646_v41, %v623_v35 }
 0x278   :  { %vm645_vm5 = vcmp.gt.f32.partialorder %v643_v33, 0.0 }
 0x279   :  { %vm620_vm2 = vcmp.gt.f32.partialorder %v618_v37, 0.0  ;;  %v647_v46 = vsel %vm645_vm5, %v643_v33, 0.0  ;;  %v729_v48 = vsel %vm645_vm5, 1.0, %v760_v58  ;;  %v668_v0 = vsel %vm225_vm3, %v654_v45, 0.0 }
 0x27a   :  { %v622_v36 = vsel %vm620_vm2, %v618_v37, 0.0  ;;  %v727_v31 = vsel %vm620_vm2, 1.0, %v760_v58  ;;  %v656_v52 = vsel %vm225_vm3, %v648_v38, 0.0 }
 0x27b   :  { %v624_v43 = vadd.f32 %v622_v36, %v599_v39  ;;  %v630_v44 = vadd.f32 %v727_v31, %v605_v40 }
 0x27d   :  { %v649_v5 = vadd.f32 %v647_v46, %v624_v43  ;;  %v655_v50 = vadd.f32 %v729_v48, %v630_v44 }
 0x27f   :  { %v669_v47 = vsel %vm225_vm3, %v655_v50, 0.0  ;;  %v657_v56 = vsel %vm225_vm3, %v649_v5, 0.0 }
 0x280   :  { %v670_v57 = vadd.f32 %v669_v47, %v668_v0  ;;  %v658_v59 = vadd.f32 %v657_v56, %v656_v52 }
 0x282   :  { %671 = vadd.xlane.f32.xlu2 %v670_v57  ;;  %659 = vadd.xlane.f32.xlu1 %v658_v59 }
 0x2f5   :  { %v672_v60 = vpop.xlane.xlu2 %671  ;;  %v660_v61 = vpop.xlane.xlu1 %659 }
 0x2f6   :  { %v673_v62 = vrot.slane %v672_v60, 4  ;;  %v661_v63 = vrot.slane %v660_v61, 4 }
 0x2f8   :  { %v674_v2 = vadd.f32 %v673_v62, %v672_v60  ;;  %v662_v58 = vadd.f32 %v661_v63, %v660_v61 }
 0x2fa   :  { %v675_v3 = vrot.slane %v674_v2, 2  ;;  %v663_v6 = vrot.slane %v662_v58, 2 }
 0x2fc   :  { %v676_v7 = vadd.f32 %v675_v3, %v674_v2  ;;  %v664_v9 = vadd.f32 %v663_v6, %v662_v58 }
 0x2fe   :  { %v665_v12 = vrot.slane %v664_v9, 1  ;;  %v677_v13 = vrot.slane %v676_v7, 1 }
 0x300   :  { %v666_v14 = vadd.f32 %v665_v12, %v664_v9  ;;  %v678_v51 = vadd.f32 %v677_v13, %v676_v7 }
 0x302   :  { %732 = vpush %v666_v14 }
 0x303   :  { %734 = vpush %v678_v51 }
 0x333   :  { %s733_s2 = spop %732 }
 0x334   :  { %v680_v15 = vstv %s733_s2  ;;  %s735_s29 = spop %734 }
 0x335   :  { %681 = vst [vmem:[%s1199_s4] sm:$0xff] %v680_v15  ;;  %v682_v16 = vstv %s735_s29 }
 0x336   :  { %683 = vst [vmem:[%s1200_s5] sm:$0xff] %v682_v16 }

</bundles_post_ra>
